<compile_context>
chip_gen: v6e
topology: v6e:2x2x1
jax: 0.10.0
libtpu: 0.0.40
codegen_flags: <defaults>
</compile_context>

<pallas_src>
import functools

import jax
import jax.numpy as jnp
from jax.experimental import pallas as pl
from jax.experimental.pallas import tpu as pltpu


def _round_up(x, m):
    return ((x + m - 1) // m) * m


def _update_kernel(v_ref, s_ref, wbig_ref, w1s_ref, w1n_ref, b1_ref, w2_ref, b2_ref,
                   out_ref, *, num_features):
    F = num_features
    cdt = wbig_ref.dtype                              # bf16 MXU-operand dtype

    v = v_ref[...]                                    # (tn, 3F) f32: [vx | vy | vz]
    s = s_ref[...]                                    # (tn, F)  f32

    # --- fused U/V projection for all 3 spatial components (one MXU matmul) ----
    # wbig = [blockdiag(wU,wU,wU) | blockdiag(wV,wV,wV)] : (3F, 6F)
    UV = jnp.dot(v.astype(cdt), wbig_ref[...],
                 preferred_element_type=jnp.float32)  # (tn, 6F)
    U = UV[:, 0:3 * F]                                # [Ux | Uy | Uz]
    V = UV[:, 3 * F:6 * F]                            # [Vx | Vy | Vz]

    # --- scalar branch: norm of V over the spatial axis (no eps, as in torch) --
    V2 = V * V
    norm_V = jnp.sqrt(V2[:, 0:F] + V2[:, F:2 * F] + V2[:, 2 * F:3 * F])  # (tn, F)

    # --- MLP: Linear(2F->F) -> SiLU -> Linear(F->3F) ---------------------------
    # concat([s, norm_V]) @ W1 rewritten as two accumulated matmuls (no lane concat).
    h = (jnp.dot(s.astype(cdt), w1s_ref[...], preferred_element_type=jnp.float32)
         + jnp.dot(norm_V.astype(cdt), w1n_ref[...], preferred_element_type=jnp.float32)
         + b1_ref[...])
    h = h * jax.nn.sigmoid(h)                         # SiLU (f32, EUP)
    a = (jnp.dot(h.astype(cdt), w2_ref[...], preferred_element_type=jnp.float32)
         + b2_ref[...])                               # (tn, 3F)
    a_vv = a[:, 0:F]
    a_sv = a[:, F:2 * F]
    a_ss = a[:, 2 * F:3 * F]

    # --- outputs: one lane-dense slab [dsiu | U*a_vv (x,y,z)] -> (tn, 4F) ------
    UVp = U * V
    scalar_prod = UVp[:, 0:F] + UVp[:, F:2 * F] + UVp[:, 2 * F:3 * F]     # (tn, F)
    dsiu = scalar_prod * a_sv + a_ss                                       # (tn, F)
    dviu = U * jnp.concatenate([a_vv, a_vv, a_vv], axis=1)                 # (tn, 3F)
    out_ref[...] = jnp.concatenate([dsiu, dviu], axis=1).astype(out_ref.dtype)


def _block_diag3(w):
    z = jnp.zeros_like(w)
    return jnp.concatenate([
        jnp.concatenate([w, z, z], axis=1),
        jnp.concatenate([z, w, z], axis=1),
        jnp.concatenate([z, z, w], axis=1)], axis=0)


def prepare_update_params(params, compute_dtype=jnp.bfloat16):
    """One-time (init-time) weight preprocessing for the kernel."""
    wU, wV, w1, b1, w2, b2 = params
    F = wU.shape[0]
    # Fused, block-diagonal U/V projection weight: (3F, 6F).
    wbig = jnp.concatenate([_block_diag3(wU), _block_diag3(wV)], axis=1)
    wbig = wbig.astype(compute_dtype)
    w1s = w1[0:F, :].astype(compute_dtype)            # s-half of first MLP layer
    w1n = w1[F:2 * F, :].astype(compute_dtype)        # norm(V)-half
    w2c = w2.astype(compute_dtype)
    b1r = b1.reshape(1, F).astype(jnp.float32)
    b2r = b2.reshape(1, 3 * F).astype(jnp.float32)
    return (wbig, w1s, w1n, b1r, w2c, b2r)


@functools.partial(jax.jit, static_argnames=("max_tile_n", "min_tiles"))
def painn_update(v_j, s_j, prepared, max_tile_n=1024, min_tiles=2):
    """PaiNN Update forward.

    v_j: (N, 3, F) float32 vector features.
    s_j: (N, F)    float32 scalar features.
    prepared: output of prepare_update_params(params).
    Returns (delta_viu (N, 3, F), delta_siu (N, F)).
    """
    N, three, F = v_j.shape
    assert three == 3 and s_j.shape == (N, F)
    wbig, w1s, w1n, b1, w2, b2 = prepared

    # Tiling: round N up only to a sublane multiple (8); split into >= min_tiles
    # tiles so both v7x TensorCores get work; cap the tile size for large N.
    Np8 = _round_up(N, 8)
    n_tiles = max(min_tiles, pl.cdiv(Np8, max_tile_n))
    tile_n = _round_up(pl.cdiv(Np8, n_tiles), 8)
    n_tiles = pl.cdiv(Np8, tile_n)
    Np = n_tiles * tile_n

    v_flat = v_j.reshape(N, 3 * F)                    # free row-major view of (N,3,F)
    if Np != N:
        v_flat = jnp.pad(v_flat, ((0, Np - N), (0, 0)))
        s_p = jnp.pad(s_j, ((0, Np - N), (0, 0)))
    else:
        s_p = s_j

    kernel = functools.partial(_update_kernel, num_features=F)
    full = lambda i: (0, 0)

    out = pl.pallas_call(
        kernel,
        out_shape=jax.ShapeDtypeStruct((Np, 4 * F), v_j.dtype),
        grid_spec=pltpu.PrefetchScalarGridSpec(
            num_scalar_prefetch=0,
            grid=(n_tiles,),
            in_specs=[
                pl.BlockSpec((tile_n, 3 * F), lambda i: (i, 0)),  # v (atoms, 3F)
                pl.BlockSpec((tile_n, F), lambda i: (i, 0)),      # s (atoms, F)
                pl.BlockSpec((3 * F, 6 * F), full),               # W_UV block-diag
                pl.BlockSpec((F, F), full),                       # W1_s
                pl.BlockSpec((F, F), full),                       # W1_norm
                pl.BlockSpec((1, F), full),                       # b1
                pl.BlockSpec((F, 3 * F), full),                   # W2
                pl.BlockSpec((1, 3 * F), full),                   # b2
            ],
            out_specs=pl.BlockSpec((tile_n, 4 * F), lambda i: (i, 0)),
        ),
        compiler_params=pltpu.CompilerParams(dimension_semantics=("parallel",)),
    )(v_flat, s_p, wbig, w1s, w1n, b1, w2, b2)

    delta_siu = out[:N, 0:F]
    delta_viu = out[:N, F:4 * F].reshape(N, 3, F)     # free reshape, no transpose
    return delta_viu, delta_siu


def painn_update_ref(v_j, s_j, params):
    """Pure-JAX reference mirroring the PyTorch forward (f32 throughout)."""
    wU, wV, w1, b1, w2, b2 = params
    F = s_j.shape[-1]
    U = jnp.einsum("naf,fg->nag", v_j, wU)
    V = jnp.einsum("naf,fg->nag", v_j, wV)
    stack = jnp.concatenate([s_j, jnp.linalg.norm(V, axis=1)], axis=-1)
    h = stack @ w1 + b1
    h = h * jax.nn.sigmoid(h)
    a = h @ w2 + b2
    a_vv, a_sv, a_ss = a[:, :F], a[:, F:2 * F], a[:, 2 * F:]
    scalar_prod = jnp.sum(U * V, axis=1)
    return U * a_vv[:, None, :], scalar_prod * a_sv + a_ss


def init_params(key, num_features):
    """Deterministic synthetic parameters (shapes match the PyTorch module)."""
    F = num_features
    ks = jax.random.split(key, 6)
    scale = lambda fan_in: 1.0 / jnp.sqrt(fan_in)
    wU = jax.random.uniform(ks[0], (F, F), jnp.float32, -1, 1) * scale(F)
    wV = jax.random.uniform(ks[1], (F, F), jnp.float32, -1, 1) * scale(F)
    w1 = jax.random.uniform(ks[2], (2 * F, F), jnp.float32, -1, 1) * scale(2 * F)
    b1 = jax.random.uniform(ks[3], (F,), jnp.float32, -1, 1) * scale(2 * F)
    w2 = jax.random.uniform(ks[4], (F, 3 * F), jnp.float32, -1, 1) * scale(F)
    b2 = jax.random.uniform(ks[5], (3 * F,), jnp.float32, -1, 1) * scale(F)
    return (wU, wV, w1, b1, w2, b2)


if __name__ == "__main__":
    N_i = 300          # atoms / nodes (not a multiple of 8 -> exercises padding path)
    num_features = 32  # F

    key = jax.random.PRNGKey(0)
    k_v, k_s, k_p = jax.random.split(key, 3)
    v_j = jax.random.normal(k_v, (N_i, 3, num_features), jnp.float32)
    s_j = jax.random.normal(k_s, (N_i, num_features), jnp.float32)
    params = init_params(k_p, num_features)
    prepared = prepare_update_params(params)   # one-time weight prep (bf16)

    delta_viu, delta_siu = painn_update(v_j, s_j, prepared)
    jax.block_until_ready((delta_viu, delta_siu))

    ref_viu, ref_siu = painn_update_ref(v_j, s_j, params)
    assert delta_viu.shape == (N_i, 3, num_features)
    assert delta_siu.shape == (N_i, num_features)
    # bf16 MXU operands (f32 accumulation) vs. f32 reference -> relaxed tolerance.
    assert jnp.allclose(delta_viu, ref_viu, atol=5e-2, rtol=5e-2)
    assert jnp.allclose(delta_siu, ref_siu, atol=5e-2, rtol=5e-2)

    print("KERNEL_OK")
</pallas_src>

<mosaic_0001>
module attributes {stable_mosaic.version = 11 : i64} {
  func.func @_update_kernel(%arg0: i32, %arg1: memref<152x96xf32, #tpu.memory_space<vmem>>, %arg2: memref<152x32xf32, #tpu.memory_space<vmem>>, %arg3: memref<96x192xbf16, #tpu.memory_space<vmem>>, %arg4: memref<32x32xbf16, #tpu.memory_space<vmem>>, %arg5: memref<32x32xbf16, #tpu.memory_space<vmem>>, %arg6: memref<1x32xf32, #tpu.memory_space<vmem>>, %arg7: memref<32x96xbf16, #tpu.memory_space<vmem>>, %arg8: memref<1x96xf32, #tpu.memory_space<vmem>>, %arg9: memref<152x128xf32, #tpu.memory_space<vmem>>) attributes {dimension_semantics = [#tpu.dimension_semantics<parallel>], iteration_bounds = array<i64: 2>, scalar_prefetch = 0 : i64, scratch_operands = 0 : i64, tpu.core_type = #tpu.core_type<tc>, window_params = [{transform_indices = @transform_0, window_bounds = array<i64: 152, 96>}, {transform_indices = @transform_1, window_bounds = array<i64: 152, 32>}, {pipeline_mode = #tpu.pipeline_mode<synchronous>, transform_indices = @transform_2, window_bounds = array<i64: 96, 192>}, {pipeline_mode = #tpu.pipeline_mode<synchronous>, transform_indices = @transform_3, window_bounds = array<i64: 32, 32>}, {pipeline_mode = #tpu.pipeline_mode<synchronous>, transform_indices = @transform_4, window_bounds = array<i64: 32, 32>}, {pipeline_mode = #tpu.pipeline_mode<synchronous>, transform_indices = @transform_5, window_bounds = array<i64: 1, 32>}, {pipeline_mode = #tpu.pipeline_mode<synchronous>, transform_indices = @transform_6, window_bounds = array<i64: 32, 96>}, {pipeline_mode = #tpu.pipeline_mode<synchronous>, transform_indices = @transform_7, window_bounds = array<i64: 1, 96>}, {transform_indices = @transform_8, window_bounds = array<i64: 152, 128>}]} {
    %c0 = arith.constant 0 : index
    %c0_0 = arith.constant 0 : index
    %0 = vector.load %arg1[%c0, %c0_0] : memref<152x96xf32, #tpu.memory_space<vmem>>, vector<152x96xf32>
    %c0_1 = arith.constant 0 : index
    %c0_2 = arith.constant 0 : index
    %1 = vector.load %arg2[%c0_1, %c0_2] : memref<152x32xf32, #tpu.memory_space<vmem>>, vector<152x32xf32>
    %2 = arith.truncf %0 : vector<152x96xf32> to vector<152x96xbf16>
    %c0_3 = arith.constant 0 : index
    %c0_4 = arith.constant 0 : index
    %3 = vector.load %arg3[%c0_3, %c0_4] : memref<96x192xbf16, #tpu.memory_space<vmem>>, vector<96x192xbf16>
    %cst = arith.constant dense<0.000000e+00> : vector<152x192xf32>
    %4 = tpu.matmul %2, %3, %cst {dimension_numbers = #tpu.dot_dimension_numbers<[1], [0], [0], [1], [0, 0, 1, 1], [], []>} : vector<152x96xbf16>, vector<96x192xbf16>, vector<152x192xf32> -> vector<152x192xf32>
    %5 = vector.extract_strided_slice %4 {offsets = [0, 0], sizes = [152, 96], strides = [1, 1]} : vector<152x192xf32> to vector<152x96xf32>
    %6 = vector.extract_strided_slice %4 {offsets = [0, 96], sizes = [152, 96], strides = [1, 1]} : vector<152x192xf32> to vector<152x96xf32>
    %7 = arith.mulf %6, %6 : vector<152x96xf32>
    %8 = vector.extract_strided_slice %7 {offsets = [0, 0], sizes = [152, 32], strides = [1, 1]} : vector<152x96xf32> to vector<152x32xf32>
    %9 = vector.extract_strided_slice %7 {offsets = [0, 32], sizes = [152, 32], strides = [1, 1]} : vector<152x96xf32> to vector<152x32xf32>
    %10 = arith.addf %8, %9 : vector<152x32xf32>
    %11 = vector.extract_strided_slice %7 {offsets = [0, 64], sizes = [152, 32], strides = [1, 1]} : vector<152x96xf32> to vector<152x32xf32>
    %12 = arith.addf %10, %11 : vector<152x32xf32>
    %13 = math.sqrt %12 : vector<152x32xf32>
    %14 = arith.truncf %1 : vector<152x32xf32> to vector<152x32xbf16>
    %c0_5 = arith.constant 0 : index
    %c0_6 = arith.constant 0 : index
    %15 = vector.load %arg4[%c0_5, %c0_6] : memref<32x32xbf16, #tpu.memory_space<vmem>>, vector<32x32xbf16>
    %cst_7 = arith.constant dense<0.000000e+00> : vector<152x32xf32>
    %16 = tpu.matmul %14, %15, %cst_7 {dimension_numbers = #tpu.dot_dimension_numbers<[1], [0], [0], [1], [0, 0, 1, 1], [], []>} : vector<152x32xbf16>, vector<32x32xbf16>, vector<152x32xf32> -> vector<152x32xf32>
    %17 = arith.truncf %13 : vector<152x32xf32> to vector<152x32xbf16>
    %c0_8 = arith.constant 0 : index
    %c0_9 = arith.constant 0 : index
    %18 = vector.load %arg5[%c0_8, %c0_9] : memref<32x32xbf16, #tpu.memory_space<vmem>>, vector<32x32xbf16>
    %cst_10 = arith.constant dense<0.000000e+00> : vector<152x32xf32>
    %19 = tpu.matmul %17, %18, %cst_10 {dimension_numbers = #tpu.dot_dimension_numbers<[1], [0], [0], [1], [0, 0, 1, 1], [], []>} : vector<152x32xbf16>, vector<32x32xbf16>, vector<152x32xf32> -> vector<152x32xf32>
    %20 = arith.addf %16, %19 : vector<152x32xf32>
    %c0_11 = arith.constant 0 : index
    %c0_12 = arith.constant 0 : index
    %21 = vector.load %arg6[%c0_11, %c0_12] : memref<1x32xf32, #tpu.memory_space<vmem>>, vector<1x32xf32>
    %22 = vector.broadcast %21 : vector<1x32xf32> to vector<152x32xf32>
    %23 = arith.addf %20, %22 : vector<152x32xf32>
    %24 = arith.negf %23 : vector<152x32xf32>
    %25 = math.exp %24 : vector<152x32xf32>
    %cst_13 = arith.constant 1.000000e+00 : f32
    %26 = vector.broadcast %cst_13 : f32 to vector<152x32xf32>
    %27 = arith.addf %26, %25 : vector<152x32xf32>
    %28 = arith.divf %26, %27 : vector<152x32xf32>
    %29 = arith.mulf %23, %28 : vector<152x32xf32>
    %30 = arith.truncf %29 : vector<152x32xf32> to vector<152x32xbf16>
    %c0_14 = arith.constant 0 : index
    %c0_15 = arith.constant 0 : index
    %31 = vector.load %arg7[%c0_14, %c0_15] : memref<32x96xbf16, #tpu.memory_space<vmem>>, vector<32x96xbf16>
    %cst_16 = arith.constant dense<0.000000e+00> : vector<152x96xf32>
    %32 = tpu.matmul %30, %31, %cst_16 {dimension_numbers = #tpu.dot_dimension_numbers<[1], [0], [0], [1], [0, 0, 1, 1], [], []>} : vector<152x32xbf16>, vector<32x96xbf16>, vector<152x96xf32> -> vector<152x96xf32>
    %c0_17 = arith.constant 0 : index
    %c0_18 = arith.constant 0 : index
    %33 = vector.load %arg8[%c0_17, %c0_18] : memref<1x96xf32, #tpu.memory_space<vmem>>, vector<1x96xf32>
    %34 = vector.broadcast %33 : vector<1x96xf32> to vector<152x96xf32>
    %35 = arith.addf %32, %34 : vector<152x96xf32>
    %36 = vector.extract_strided_slice %35 {offsets = [0, 0], sizes = [152, 32], strides = [1, 1]} : vector<152x96xf32> to vector<152x32xf32>
    %37 = vector.extract_strided_slice %35 {offsets = [0, 32], sizes = [152, 32], strides = [1, 1]} : vector<152x96xf32> to vector<152x32xf32>
    %38 = vector.extract_strided_slice %35 {offsets = [0, 64], sizes = [152, 32], strides = [1, 1]} : vector<152x96xf32> to vector<152x32xf32>
    %39 = arith.mulf %5, %6 : vector<152x96xf32>
    %40 = vector.extract_strided_slice %39 {offsets = [0, 0], sizes = [152, 32], strides = [1, 1]} : vector<152x96xf32> to vector<152x32xf32>
    %41 = vector.extract_strided_slice %39 {offsets = [0, 32], sizes = [152, 32], strides = [1, 1]} : vector<152x96xf32> to vector<152x32xf32>
    %42 = arith.addf %40, %41 : vector<152x32xf32>
    %43 = vector.extract_strided_slice %39 {offsets = [0, 64], sizes = [152, 32], strides = [1, 1]} : vector<152x96xf32> to vector<152x32xf32>
    %44 = arith.addf %42, %43 : vector<152x32xf32>
    %45 = arith.mulf %44, %37 : vector<152x32xf32>
    %46 = arith.addf %45, %38 : vector<152x32xf32>
    %47 = tpu.concatenate %36, %36, %36 in 1 : vector<152x32xf32>, vector<152x32xf32>, vector<152x32xf32> -> vector<152x96xf32>
    %48 = arith.mulf %5, %47 : vector<152x96xf32>
    %49 = tpu.concatenate %46, %48 in 1 : vector<152x32xf32>, vector<152x96xf32> -> vector<152x128xf32>
    %c0_19 = arith.constant 0 : index
    %c0_20 = arith.constant 0 : index
    %50 = vector.load %arg9[%c0_19, %c0_20] : memref<152x128xf32, #tpu.memory_space<vmem>>, vector<152x128xf32>
    tpu.vector_store %arg9[%c0_19, %c0_20], %49 {strides = array<i32>} : memref<152x128xf32, #tpu.memory_space<vmem>>, vector<152x128xf32>,
    return
  }
  func.func @transform_0(%arg0: i32) -> (i32, i32) {
    %c0_i32 = arith.constant 0 : i32
    %c0_i32_0 = arith.constant 0 : i32
    return %arg0, %c0_i32 : i32, i32
  }
  func.func @transform_1(%arg0: i32) -> (i32, i32) {
    %c0_i32 = arith.constant 0 : i32
    %c0_i32_0 = arith.constant 0 : i32
    return %arg0, %c0_i32 : i32, i32
  }
  func.func @transform_2(%arg0: i32) -> (i32, i32) {
    %c0_i32 = arith.constant 0 : i32
    %c0_i32_0 = arith.constant 0 : i32
    %c0_i32_1 = arith.constant 0 : i32
    return %c0_i32, %c0_i32_0 : i32, i32
  }
  func.func @transform_3(%arg0: i32) -> (i32, i32) {
    %c0_i32 = arith.constant 0 : i32
    %c0_i32_0 = arith.constant 0 : i32
    %c0_i32_1 = arith.constant 0 : i32
    return %c0_i32, %c0_i32_0 : i32, i32
  }
  func.func @transform_4(%arg0: i32) -> (i32, i32) {
    %c0_i32 = arith.constant 0 : i32
    %c0_i32_0 = arith.constant 0 : i32
    %c0_i32_1 = arith.constant 0 : i32
    return %c0_i32, %c0_i32_0 : i32, i32
  }
  func.func @transform_5(%arg0: i32) -> (i32, i32) {
    %c0_i32 = arith.constant 0 : i32
    %c0_i32_0 = arith.constant 0 : i32
    %c0_i32_1 = arith.constant 0 : i32
    return %c0_i32, %c0_i32_0 : i32, i32
  }
  func.func @transform_6(%arg0: i32) -> (i32, i32) {
    %c0_i32 = arith.constant 0 : i32
    %c0_i32_0 = arith.constant 0 : i32
    %c0_i32_1 = arith.constant 0 : i32
    return %c0_i32, %c0_i32_0 : i32, i32
  }
  func.func @transform_7(%arg0: i32) -> (i32, i32) {
    %c0_i32 = arith.constant 0 : i32
    %c0_i32_0 = arith.constant 0 : i32
    %c0_i32_1 = arith.constant 0 : i32
    return %c0_i32, %c0_i32_0 : i32, i32
  }
  func.func @transform_8(%arg0: i32) -> (i32, i32) {
    %c0_i32 = arith.constant 0 : i32
    %c0_i32_0 = arith.constant 0 : i32
    return %arg0, %c0_i32 : i32, i32
  }
}

</mosaic_0001>

<bundles_post_ra>
// kernel: painn_update.1
= control target key start
LH: loop header
LB: loop body
LE: loop exit
PB: predicated region body
PF: predicated region fallthrough
CT: control target
= control target key end

     0   :  { %s2875_s27 = smov 0   ;;  %s4229_s0 = inlined_call_operand.vmem [shape: f32[304,96], index: 0, kind: input, shape index: {}]   ;;  %s4230_s1 = inlined_call_operand.vmem [shape: f32[304,32], index: 1, kind: input, shape index: {}]   ;;  %s4231_s2 = inlined_call_operand.vmem [shape: bf16[96,192], index: 2, kind: input, shape index: {}]   ;;  %s4232_s3 = inlined_call_operand.vmem [shape: bf16[32,32], index: 3, kind: input, shape index: {}]   ;;  %s4233_s4 = inlined_call_operand.vmem [shape: bf16[32,32], index: 4, kind: input, shape index: {}]   ;;  %s4234_s5 = inlined_call_operand.vmem [shape: f32[1,32], index: 5, kind: input, shape index: {}]   ;;  %s4235_s6 = inlined_call_operand.vmem [shape: bf16[32,96], index: 6, kind: input, shape index: {}]   ;;  %s4236_s7 = inlined_call_operand.vmem [shape: f32[1,96], index: 7, kind: input, shape index: {}]   ;;  %s4237_s8 = inlined_call_operand.vmem [shape: f32[304,128], index: 8, kind: output, shape index: {}]  }
   0x1 LB: > { %s2467_s28 = sadd.s32 4294967295, %s2824_s27   ;;  %p2471_p0 = scmp.ge.s32.totalorder %s2824_s27, 1  ;;  %s2824_s27 = sphi %s2875_s27, %s18_s27  }
   0x2   : > { %p274_p1 = scmp.lt.s32.totalorder %s2824_s27, 3 }
   0x4   : > { %p275_p2 = pnand %p2471_p0, %p274_p1 }
   0x6   : > { %278 = sbr.rel (%p275_p2) target bundleno = 1349 (0x545), region = 52 }
   0xb   : > { %v2680_v0 = vld [vmem:[%s4231_s2 + $0x54] ss:$8 sps:$4 sm:$0xff]   ;;  %v2682_v1 = vld [vmem:[%s4231_s2 + $0x50] ss:$8 sps:$4 sm:$0xff]   ;;  %v2826_v2 = vmov 0   ;;  %s313_s11 = smul.u32 19, %s2467_s28 }
   0xc   : > { %515 = vmatprep.mubr.bf16.mxu0 %v2826_v2  ;;  %487 = vmatprep.subr.bf16.mxu0 %v2680_v0  ;;  %v2683_v3 = vld [vmem:[%s4231_s2 + $0x44] ss:$8 sps:$4 sm:$0xff]   ;;  %v2685_v4 = vld [vmem:[%s4231_s2 + $0x40] ss:$8 sps:$4 sm:$0xff]   ;;  %v2686_v5 = vld [vmem:[%s4231_s2 + $0x34] ss:$8 sps:$4 sm:$0xff]  }
   0xd   : > { %488 = vmatpush1.bf16.msra.mxu0 %v2682_v1  ;;  %p314_p3 = scmp.lt.s32.totalorder %s313_s11, 37  ;;  %v2688_v6 = vld [vmem:[%s4231_s2 + $0x30] ss:$8 sps:$4 sm:$0xff]   ;;  %v2689_v7 = vld [vmem:[%s4231_s2 + $0x24] ss:$8 sps:$4 sm:$0xff]   ;;  %vm452_vm0 = vcmask 785408  }
   0xe   : > { %489 = vmatprep.subr.bf16.mxu0 %v2683_v3  ;;  %v2691_v8 = vld [vmem:[%s4231_s2 + $0x20] ss:$8 sps:$4 sm:$0xff]   ;;  %v2692_v9 = vld [vmem:[%s4231_s2 + $0x14] ss:$8 sps:$4 sm:$0xff]   ;;  %v2694_v10 = vld [vmem:[%s4231_s2 + $0x10] ss:$8 sps:$4 sm:$0xff]  }
   0xf   : > { %s4347_s11 = smov (!%p314_p3, %s313_s11), 37  ;;  %v2695_v11 = vld [vmem:[%s4231_s2 + $0x4] ss:$8 sps:$4 sm:$0xff]   ;;  %v2697_v12 = vld [vmem:[%s4231_s2] ss:$8 sps:$4 sm:$0xff]   ;;  %s2827_s15 = smov 96  }
  0x10   : > { %s2914_s29 = sshll.u32 %s4347_s11, 3  ;;  %s2828_s16 = smov 64  }
  0x11   : > { %490 = vmatpush1.bf16.msra.mxu0 %v2685_v4  ;;  %s2923_s13 = scalar_lea.vmem %s4229_s0, %s2914_s29  ;;  %s2829_s21 = smov 32  }
  0x12   : > { %491 = vmatprep.subr.bf16.mxu0 %v2686_v5  ;;  %v332_v13 = vld [vmem:[%s2923_s13] sm:$0xff]  ;;  %v333_v14 = vld [vmem:[%s2923_s13 + $0x8] sm:$0xff]  ;;  %v334_v16 = vld [vmem:[%s2923_s13 + $0x10] sm:$0xff]  ;;  %s3394_s30 = scalar_lea.vmem %s4230_s1, %s2914_s29  ;;  %s4170_s19 = scalar_lea.vmem %s4237_s8, %s2914_s29 }
  0x13   : > { %v370_v15 = vpack.c.bf16 %v333_v14, %v332_v13  ;;  %v335_v17 = vld [vmem:[%s2923_s13 + $0x18] sm:$0xff]  ;;  %v336_v19 = vld [vmem:[%s2923_s13 + $0x20] sm:$0xff]  ;;  %v337_v20 = vld [vmem:[%s2923_s13 + $0x28] sm:$0xff] }
  0x14   : > { %v371_v18 = vpack.c.bf16 %v335_v17, %v334_v16  ;;  %v372_v21 = vpack.c.bf16 %v337_v20, %v336_v19  ;;  %v338_v22 = vld [vmem:[%s2923_s13 + $0x30] sm:$0xff]  ;;  %v339_v23 = vld [vmem:[%s2923_s13 + $0x38] sm:$0xff]  ;;  %v340_v25 = vld [vmem:[%s2923_s13 + $0x40] sm:$0xff] }
  0x15   : > { %492 = vmatpush1.bf16.msra.mxu0 %v2688_v6  ;;  %v373_v24 = vpack.c.bf16 %v339_v23, %v338_v22  ;;  %v341_v26 = vld [vmem:[%s2923_s13 + $0x48] sm:$0xff]  ;;  %v342_v28 = vld [vmem:[%s2923_s13 + $0x50] sm:$0xff]  ;;  %v343_v29 = vld [vmem:[%s2923_s13 + $0x58] sm:$0xff] }
  0x16   : > { %493 = vmatprep.subr.bf16.mxu0 %v2689_v7  ;;  %v374_v27 = vpack.c.bf16 %v341_v26, %v340_v25  ;;  %v375_v30 = vpack.c.bf16 %v343_v29, %v342_v28  ;;  %v344_v31 = vld [vmem:[%s2923_s13 + $0x60] sm:$0xff]  ;;  %v345_v32 = vld [vmem:[%s2923_s13 + $0x68] sm:$0xff]  ;;  %v346_v34 = vld [vmem:[%s2923_s13 + $0x70] sm:$0xff] }
  0x17   : > { %v376_v33 = vpack.c.bf16 %v345_v32, %v344_v31  ;;  %v347_v35 = vld [vmem:[%s2923_s13 + $0x78] sm:$0xff]  ;;  %v348_v37 = vld [vmem:[%s2923_s13 + $0x80] sm:$0xff]  ;;  %v349_v38 = vld [vmem:[%s2923_s13 + $0x88] sm:$0xff] }
  0x18   : > { %v377_v36 = vpack.c.bf16 %v347_v35, %v346_v34  ;;  %v378_v39 = vpack.c.bf16 %v349_v38, %v348_v37  ;;  %v350_v40 = vld [vmem:[%s2923_s13 + $0x90] sm:$0xff]  ;;  %v2698_v38 = vld [vmem:[%s4233_s4 + $0x8] sm:$0xff]  }
  0x19   : > { %494 = vmatpush1.bf16.msra.mxu0 %v2691_v8  ;;  %v379_v41 = vpack.c.bf16 %v350_v40, %v350_v40  ;;  %2664 = vmatprep.subr.bf16.mxu1 %v2698_v38 }
  0x1a   : > { %495 = vmatprep.subr.bf16.mxu0 %v2692_v9  ;;  %2666 = vmatpush3.bf16.msra.mxu1 %v2698_v38 }
  0x1d   : > { %496 = vmatpush1.bf16.msra.mxu0 %v2694_v10 }
  0x1e   : > { %497 = vmatprep.subr.bf16.mxu0 %v2695_v11 }
  0x21   : > { %498 = vmatpush1.bf16.msra.mxu0 %v2697_v12 }
  0x22   : > { %2592 = vmatprep.subr.bf16.mxu0 %v2698_v38 }
  0x24   : > { %2487 = vmatmul.mubr.msk.bf16.vlgmr.msra.gmra.mxu0 %vm452_vm0, %v370_v15 }
  0x25   : > { %525 = vmatprep.mubr.bf16.mxu0 %v2826_v2  ;;  %2593 = vmatpush3.bf16.msra.mxu0 %v2698_v38 }
  0x2c   : > { %2488 = vmatmul.mubr.msk.bf16.gmra.mxu0 %vm452_vm0, %v371_v18 }
  0x2d   : > { %535 = vmatprep.mubr.bf16.mxu0 %v2826_v2 }
  0x34   : > { %2489 = vmatmul.mubr.msk.bf16.gmra.mxu0 %vm452_vm0, %v372_v21 }
  0x35   : > { %545 = vmatprep.mubr.bf16.mxu0 %v2826_v2 }
  0x3c   : > { %2490 = vmatmul.mubr.msk.bf16.gmra.mxu0 %vm452_vm0, %v373_v24 }
  0x3d   : > { %555 = vmatprep.mubr.bf16.mxu0 %v2826_v2 }
  0x44   : > { %2491 = vmatmul.mubr.msk.bf16.gmra.mxu0 %vm452_vm0, %v374_v27 }
  0x45   : > { %565 = vmatprep.mubr.bf16.mxu0 %v2826_v2 }
  0x4c   : > { %2492 = vmatmul.mubr.msk.bf16.gmra.mxu0 %vm452_vm0, %v375_v30 }
  0x4d   : > { %575 = vmatprep.mubr.bf16.mxu0 %v2826_v2 }
  0x54   : > { %2493 = vmatmul.mubr.msk.bf16.gmra.mxu0 %vm452_vm0, %v376_v33 }
  0x55   : > { %585 = vmatprep.mubr.bf16.mxu0 %v2826_v2 }
  0x5c   : > { %2494 = vmatmul.mubr.msk.bf16.gmra.mxu0 %vm452_vm0, %v377_v36 }
  0x5d   : > { %595 = vmatprep.mubr.bf16.mxu0 %v2826_v2 }
  0x64   : > { %2495 = vmatmul.mubr.msk.bf16.gmra.mxu0 %vm452_vm0, %v378_v39 }
  0x65   : > { %605 = vmatprep.mubr.bf16.mxu0 %v2826_v2 }
  0x6c   : > { %2496 = vmatmul.mubr.msk.bf16.gmra.mxu0 %vm452_vm0, %v379_v41 }
  0xe4   : > { %v2966_v42 = vpop.f32.mrf.mxu0 }
  0xe6   : > { %v2968_v43 = vpop.f32.mrf.mxu0 }
  0xe7   : > { %v2972_v44 = vmul.f32 %v2968_v43, %v2968_v43 }
  0xe8   : > { %v2974_v45 = vpop.f32.mrf.mxu0 }
  0xe9   : > { %671 = vrot.lane.b32.xlu0 %v2972_v44, %s2827_s15 }
  0xea   : > { %v2978_v46 = vpop.f32.mrf.mxu0 }
  0xeb   : > { %v2982_v47 = vmul.f32 %v2978_v46, %v2978_v46 }
  0xec   : > { %v2984_v48 = vpop.f32.mrf.mxu0 }
  0xed   : > { %673 = vrot.lane.b32.xlu1 %v2982_v47, %s2827_s15 }
  0xee   : > { %v2988_v49 = vpop.f32.mrf.mxu0 }
  0xef   : > { %v619_v35 = vmul.f32 %v2988_v49, %v2988_v49 }
  0xf0   : > { %v2990_v50 = vpop.f32.mrf.mxu0 }
  0xf2   : > { %v2992_v51 = vpop.f32.mrf.mxu0 }
  0xf3   : > { %v621_v36 = vmul.f32 %v2992_v51, %v2992_v51 }
  0xf4   : > { %v2994_v52 = vpop.f32.mrf.mxu0 }
  0xf5   : > { %v622_v41 = vmul.f32 %v2994_v52, %v2994_v52 }
  0xf6   : > { %v2996_v53 = vpop.f32.mrf.mxu0 }
  0xf7   : > { %v623_v54 = vmul.f32 %v2996_v53, %v2996_v53 }
  0xf8   : > { %v3000_v55 = vpop.f32.mrf.mxu0 }
  0xf9   : > { %4262 = vst [vmem:[#allocation2_spill] sm:$0xff] %v3000_v55  ;;  %679 = vrot.lane.b32.xlu0 %v623_v54, %s2827_s15 }
  0xfa   : > { %v3003_v56 = vpop.f32.mrf.mxu0 }
  0xfb   : > { %v625_v57 = vmul.f32 %v3003_v56, %v3003_v56 }
  0xfc   : > { %v3007_v58 = vpop.f32.mrf.mxu0 }
  0xfd   : > { %755 = vrot.lane.b32.xlu0 %v623_v54, %s2828_s16  ;;  %757 = vrot.lane.b32.xlu1 %v625_v57, %s2828_s16 }
  0xfe   : > { %v3011_v59 = vpop.f32.mrf.mxu0 }
  0xff   : > { %v627_v60 = vmul.f32 %v3011_v59, %v3011_v59 }
 0x100   : > { %v3015_v61 = vpop.f32.mrf.mxu0 }
 0x101   : > { %4263 = vst [vmem:[#allocation3_spill] sm:$0xff] %v3015_v61  ;;  %681 = vrot.lane.b32.xlu0 %v625_v57, %s2827_s15  ;;  %683 = vrot.lane.b32.xlu1 %v627_v60, %s2827_s15 }
 0x102   : > { %v3019_v62 = vpop.f32.mrf.mxu0 }
 0x103   : > { %v629_v63 = vmul.f32 %v3019_v62, %v3019_v62 }
 0x104   : > { %v3023_v0 = vpop.f32.mrf.mxu0 }
 0x105   : > { %4264 = vst [vmem:[#allocation4_spill] sm:$0xff] %v3023_v0  ;;  %759 = vrot.lane.b32.xlu0 %v627_v60, %s2828_s16  ;;  %685 = vrot.lane.b32.xlu1 %v629_v63, %s2827_s15  ;;  %v624_v60 = vmul.f32 %v3000_v55, %v3000_v55 }
 0x106   : > { %v3027_v1 = vpop.f32.mrf.mxu0 }
 0x107   : > { %v631_v2 = vmul.f32 %v3027_v1, %v3027_v1 }
 0x108   : > { %v3031_v3 = vpop.f32.mrf.mxu0 }
 0x109   : > { %4265 = vst [vmem:[#allocation5_spill] sm:$0xff] %v3031_v3  ;;  %761 = vrot.lane.b32.xlu1 %v629_v63, %s2828_s16  ;;  %687 = vrot.lane.b32.xlu0 %v631_v2, %s2827_s15 }
 0x10a   : > { %v3035_v4 = vpop.f32.mrf.mxu0 }
 0x10b   : > { %v633_v5 = vmul.f32 %v3035_v4, %v3035_v4 }
 0x10c   : > { %v3039_v6 = vpop.f32.mrf.mxu0 }
 0x10d   : > { %4266 = vst [vmem:[#allocation6_spill] sm:$0xff] %v3039_v6  ;;  %763 = vrot.lane.b32.xlu0 %v631_v2, %s2828_s16  ;;  %689 = vrot.lane.b32.xlu1 %v633_v5, %s2827_s15 }
 0x10e   : > { %v3043_v7 = vpop.f32.mrf.mxu0 }
 0x10f   : > { %v635_v8 = vmul.f32 %v3043_v7, %v3043_v7 }
 0x110   : > { %v3047_v9 = vpop.f32.mrf.mxu0 }
 0x111   : > { %4267 = vst [vmem:[#allocation7_spill] sm:$0xff] %v3047_v9  ;;  %765 = vrot.lane.b32.xlu1 %v633_v5, %s2828_s16  ;;  %691 = vrot.lane.b32.xlu0 %v635_v8, %s2827_s15 }
 0x112   : > { %v3051_v10 = vpop.f32.mrf.mxu0 }
 0x113   : > { %v637_v11 = vmul.f32 %v3051_v10, %v3051_v10 }
 0x114   : > { %v3055_v12 = vpop.f32.mrf.mxu0 }
 0x115   : > { %4268 = vst [vmem:[#allocation8_spill] sm:$0xff] %v3055_v12  ;;  %767 = vrot.lane.b32.xlu0 %v635_v8, %s2828_s16  ;;  %693 = vrot.lane.b32.xlu1 %v637_v11, %s2827_s15  ;;  %v626_v8 = vmul.f32 %v3007_v58, %v3007_v58 }
 0x116   : > { %v3059_v13 = vpop.f32.mrf.mxu0 }
 0x117   : > { %v639_v14 = vmul.f32 %v3059_v13, %v3059_v13 }
 0x118   : > { %v3063_v15 = vpop.f32.mrf.mxu0 }
 0x119   : > { %4269 = vst [vmem:[#allocation9_spill] sm:$0xff] %v3063_v15  ;;  %769 = vrot.lane.b32.xlu1 %v637_v11, %s2828_s16  ;;  %695 = vrot.lane.b32.xlu0 %v639_v14, %s2827_s15 }
 0x11a   : > { %v3067_v16 = vpop.f32.mrf.mxu0 }
 0x11b   : > { %v641_v17 = vmul.f32 %v3067_v16, %v3067_v16 }
 0x11c   : > { %v3071_v18 = vpop.f32.mrf.mxu0 }
 0x11d   : > { %4270 = vst [vmem:[#allocation10_spill] sm:$0xff] %v3071_v18  ;;  %771 = vrot.lane.b32.xlu0 %v639_v14, %s2828_s16  ;;  %697 = vrot.lane.b32.xlu1 %v641_v17, %s2827_s15 }
 0x11e   : > { %v3075_v19 = vpop.f32.mrf.mxu0 }
 0x11f   : > { %v643_v20 = vmul.f32 %v3075_v19, %v3075_v19 }
 0x120   : > { %v3079_v21 = vpop.f32.mrf.mxu0 }
 0x121   : > { %4271 = vst [vmem:[#allocation11_spill] sm:$0xff] %v3079_v21  ;;  %773 = vrot.lane.b32.xlu1 %v641_v17, %s2828_s16  ;;  %699 = vrot.lane.b32.xlu0 %v643_v20, %s2827_s15 }
 0x122   : > { %v3083_v22 = vpop.f32.mrf.mxu0 }
 0x123   : > { %v645_v23 = vmul.f32 %v3083_v22, %v3083_v22 }
 0x124   : > { %v3087_v24 = vpop.f32.mrf.mxu0 }
 0x125   : > { %4272 = vst [vmem:[#allocation12_spill] sm:$0xff] %v3087_v24  ;;  %775 = vrot.lane.b32.xlu0 %v643_v20, %s2828_s16  ;;  %701 = vrot.lane.b32.xlu1 %v645_v23, %s2827_s15 }
 0x126   : > { %v3091_v25 = vpop.f32.mrf.mxu0 }
 0x127   : > { %v647_v26 = vmul.f32 %v3091_v25, %v3091_v25 }
 0x128   : > { %v3095_v27 = vpop.f32.mrf.mxu0 }
 0x129   : > { %4273 = vst [vmem:[#allocation13_spill] sm:$0xff] %v3095_v27  ;;  %777 = vrot.lane.b32.xlu1 %v645_v23, %s2828_s16  ;;  %703 = vrot.lane.b32.xlu0 %v647_v26, %s2827_s15 }
 0x12a   : > { %v3099_v28 = vpop.f32.mrf.mxu0 }
 0x12b   : > { %v649_v29 = vmul.f32 %v3099_v28, %v3099_v28 }
 0x12c   : > { %v3103_v30 = vpop.f32.mrf.mxu0 }
 0x12d   : > { %4274 = vst [vmem:[#allocation14_spill] sm:$0xff] %v3103_v30  ;;  %779 = vrot.lane.b32.xlu1 %v647_v26, %s2828_s16  ;;  %781 = vrot.lane.b32.xlu0 %v649_v29, %s2828_s16  ;;  %v628_v26 = vmul.f32 %v3015_v61, %v3015_v61 }
 0x12e   : > { %v3107_v31 = vpop.f32.mrf.mxu0 }
 0x12f   : > { %4275 = vst [vmem:[#allocation15_spill] sm:$0xff] %v3107_v31  ;;  %v651_v32 = vmul.f32 %v3107_v31, %v3107_v31 }
 0x130   : > { %v611_v33 = vpop.f32.mrf.mxu0 }
 0x131   : > { %705 = vrot.lane.b32.xlu1 %v649_v29, %s2827_s15  ;;  %707 = vrot.lane.b32.xlu0 %v651_v32, %s2827_s15 }
 0x132   : > { %v612_v34 = vpop.f32.mrf.mxu0 }
 0x135   : > { %677 = vrot.lane.b32.xlu1 %v621_v36, %s2827_s15  ;;  %675 = vrot.lane.b32.xlu0 %v619_v35, %s2827_s15 }
 0x139   : > { %783 = vrot.lane.b32.xlu1 %v651_v32, %s2828_s16  ;;  %747 = vrot.lane.b32.xlu0 %v2972_v44, %s2828_s16 }
 0x13d   : > { %749 = vrot.lane.b32.xlu1 %v2982_v47, %s2828_s16  ;;  %751 = vrot.lane.b32.xlu0 %v619_v35, %s2828_s16  ;;  %v630_v35 = vmul.f32 %v3023_v0, %v3023_v0 }
 0x141   : > { %753 = vrot.lane.b32.xlu1 %v621_v36, %s2828_s16 }
 0x15b   : > { %v3126_v37 = vpop.permute.xlu0 %671 }
 0x15f   : > { %v3131_v39 = vpop.permute.xlu1 %673 }
 0x16b   : > { %v680_v40 = vpop.permute.xlu0 %679 }
 0x16c   : > { %v732_v44 = vadd.f32 %v680_v40, %v622_v41 }
 0x16f   : > { %v756_v47 = vpop.permute.xlu0 %755  ;;  %v758_v54 = vpop.permute.xlu1 %757 }
 0x170   : > { %v808_v57 = vadd.f32 %v756_v47, %v732_v44  ;;  %v2699_v44 = vld [vmem:[%s4233_s4] sm:$0xff]  }
 0x171   : > { %2665 = vmatprep.subr.bf16.mxu1 %v2699_v44  ;;  %2594 = vmatprep.subr.bf16.mxu0 %v2699_v44 }
 0x172   : > { %2704 = vrsqrt.f32 %v808_v57  ;;  %2667 = vmatpush3.bf16.msra.mxu1 %v2699_v44  ;;  %2595 = vmatpush3.bf16.msra.mxu0 %v2699_v44  ;;  %vm853_vm1 = vcmp.eq.f32.partialorder %v808_v57, inf  ;;  %vm855_vm2 = vcmp.eq.f32.partialorder %v808_v57, 0.0 }
 0x173   : > { %v682_v63 = vpop.permute.xlu0 %681  ;;  %v684_v2 = vpop.permute.xlu1 %683 }
 0x174   : > { %v733_v5 = vadd.f32 %v682_v63, %v624_v60  ;;  %v734_v14 = vadd.f32 %v684_v2, %v626_v8 }
 0x176   : > { %v809_v11 = vadd.f32 %v758_v54, %v733_v5  ;;  %v632_v54 = vmul.f32 %v3031_v3, %v3031_v3 }
 0x177   : > { %v760_v17 = vpop.permute.xlu0 %759  ;;  %v686_v20 = vpop.permute.xlu1 %685 }
 0x178   : > { %2706 = vrsqrt.f32 %v809_v11  ;;  %v3139_v23 = vadd.f32 %v760_v17, %v734_v14  ;;  %v735_v29 = vadd.f32 %v686_v20, %v628_v26  ;;  %v634_v14 = vmul.f32 %v3039_v6, %v3039_v6 }
 0x179   : > { %v636_v20 = vmul.f32 %v3047_v9, %v3047_v9  ;;  %vm860_vm3 = vcmp.eq.f32.partialorder %v809_v11, inf  ;;  %vm862_vm4 = vcmp.eq.f32.partialorder %v809_v11, 0.0 }
 0x17a   : > { %2708 = vrsqrt.f32 %v3139_v23  ;;  %vm867_vm5 = vcmp.eq.f32.partialorder %v3139_v23, inf  ;;  %vm869_vm6 = vcmp.eq.f32.partialorder %v3139_v23, 0.0 }
 0x17b   : > { %v762_v32 = vpop.permute.xlu1 %761  ;;  %v688_v33 = vpop.permute.xlu0 %687 }
 0x17c   : > { %v3144_v34 = vadd.f32 %v762_v32, %v735_v29  ;;  %v736_v36 = vadd.f32 %v688_v33, %v630_v35 }
 0x17e   : > { %2710 = vrsqrt.f32 %v3144_v34  ;;  %vm874_vm7 = vcmp.eq.f32.partialorder %v3144_v34, inf  ;;  %vm876_vm8 = vcmp.eq.f32.partialorder %v3144_v34, 0.0 }
 0x17f   : > { %v2705_v38 = vpop.eup %2704  ;;  %v764_v40 = vpop.permute.xlu0 %763 }
 0x180   : > { %v690_v41 = vpop.permute.xlu1 %689  ;;  %v3152_v47 = vadd.f32 %v764_v40, %v736_v36  ;;  %v852_v63 = vmul.f32 %v2705_v38, %v808_v57  ;;  %v856_v38 = vand.u32 2147483648, %v808_v57  ;;  %v863_v40 = vand.u32 2147483648, %v809_v11 }
 0x181   : > { %v737_v60 = vadd.f32 %v690_v41, %v632_v54 }
 0x182   : > { %2712 = vrsqrt.f32 %v3152_v47  ;;  %v854_v29 = vsel %vm853_vm1, %v808_v57, %v852_v63  ;;  %vm881_vm9 = vcmp.eq.f32.partialorder %v3152_v47, inf  ;;  %vm883_vm10 = vcmp.eq.f32.partialorder %v3152_v47, 0.0 }
 0x183   : > { %v692_v5 = vpop.permute.xlu0 %691 }
 0x184   : > { %v766_v2 = vpop.permute.xlu1 %765  ;;  %v738_v26 = vadd.f32 %v692_v5, %v634_v14 }
 0x185   : > { %v3157_v8 = vadd.f32 %v766_v2, %v737_v60  ;;  %v2707_v17 = vpop.eup %2706  ;;  %v857_v60 = vsel %vm855_vm2, %v856_v38, %v854_v29 }
 0x186   : > { %v859_v32 = vmul.f32 %v2707_v17, %v809_v11 }
 0x187   : > { %2714 = vrsqrt.f32 %v3157_v8  ;;  %v2709_v33 = vpop.eup %2708  ;;  %v768_v35 = vpop.permute.xlu0 %767  ;;  %vm888_vm11 = vcmp.eq.f32.partialorder %v3157_v8, inf  ;;  %vm890_vm12 = vcmp.eq.f32.partialorder %v3157_v8, 0.0 }
 0x188   : > { %v694_v36 = vpop.permute.xlu1 %693  ;;  %v3164_v41 = vadd.f32 %v768_v35, %v738_v26  ;;  %v861_v44 = vsel %vm860_vm3, %v809_v11, %v859_v32  ;;  %v866_v54 = vmul.f32 %v2709_v33, %v3139_v23  ;;  %v638_v26 = vmul.f32 %v3055_v12, %v3055_v12 }
 0x189   : > { %v864_v2 = vsel %vm862_vm4, %v863_v40, %v861_v44  ;;  %v739_v5 = vadd.f32 %v694_v36, %v636_v20  ;;  %v870_v20 = vand.u32 2147483648, %v3139_v23  ;;  %v877_v32 = vand.u32 2147483648, %v3144_v34 }
 0x18a   : > { %2716 = vrsqrt.f32 %v3164_v41  ;;  %v972_v63 = vpack.c.bf16 %v864_v2, %v857_v60  ;;  %v868_v11 = vsel %vm867_vm5, %v3139_v23, %v866_v54  ;;  %v640_v23 = vmul.f32 %v3063_v15, %v3063_v15 }
 0x18b   : > { %v2711_v14 = vpop.eup %2710  ;;  %v696_v31 = vpop.permute.xlu0 %695  ;;  %v871_v44 = vsel %vm869_vm6, %v870_v20, %v868_v11  ;;  %v884_v20 = vand.u32 2147483648, %v3152_v47  ;;  %vm895_vm13 = vcmp.eq.f32.partialorder %v3164_v41, inf  ;;  %vm897_vm14 = vcmp.eq.f32.partialorder %v3164_v41, 0.0 }
 0x18c   : > { %v770_v17 = vpop.permute.xlu1 %769  ;;  %998 = vrot.lane.b32.xlu0 %v972_v63, %s2829_s21  ;;  %v873_v29 = vmul.f32 %v2711_v14, %v3144_v34  ;;  %v740_v33 = vadd.f32 %v696_v31, %v638_v26  ;;  %v642_v26 = vmul.f32 %v3071_v18, %v3071_v18 }
 0x18d   : > { %v3169_v57 = vadd.f32 %v770_v17, %v739_v5 }
 0x18e   : > { %v875_v35 = vsel %vm874_vm7, %v3144_v34, %v873_v29 }
 0x18f   : > { %2718 = vrsqrt.f32 %v3169_v57  ;;  %v2713_v36 = vpop.eup %2712  ;;  %v772_v38 = vpop.permute.xlu0 %771  ;;  %v878_v54 = vsel %vm876_vm8, %v877_v32, %v875_v35  ;;  %v891_v32 = vand.u32 2147483648, %v3157_v8  ;;  %vm902_vm15 = vcmp.eq.f32.partialorder %v3169_v57, inf }
 0x190   : > { %v698_v40 = vpop.permute.xlu1 %697  ;;  %v3183_v60 = vadd.f32 %v772_v38, %v740_v33  ;;  %v973_v2 = vpack.c.bf16 %v878_v54, %v871_v44  ;;  %v880_v5 = vmul.f32 %v2713_v36, %v3152_v47  ;;  %v3207_v36 = vld [vmem:[%s4232_s3 + $0x8] sm:$0xff]   ;;  %vm904_vm0 = vcmp.eq.f32.partialorder %v3169_v57, 0.0 }
 0x191   : > { %v741_v31 = vadd.f32 %v698_v40, %v640_v23  ;;  %2616 = vmatprep.subr.bf16.mxu1 %v3207_v36 }
 0x192   : > { %2720 = vrsqrt.f32 %v3183_v60  ;;  %1000 = vrot.lane.b32.xlu1 %v973_v2, %s2829_s21  ;;  %v882_v11 = vsel %vm881_vm9, %v3152_v47, %v880_v5  ;;  %v644_v2 = vmul.f32 %v3079_v21, %v3079_v21  ;;  %vm909_vm1 = vcmp.eq.f32.partialorder %v3183_v60, inf }
 0x193   : > { %v700_v14 = vpop.permute.xlu0 %699  ;;  %v885_v47 = vsel %vm883_vm10, %v884_v20, %v882_v11  ;;  %v646_v11 = vmul.f32 %v3087_v24, %v3087_v24  ;;  %vm911_vm3 = vcmp.eq.f32.partialorder %v3183_v60, 0.0 }
 0x194   : > { %v2715_v63 = vpop.eup %2714  ;;  %v774_v34 = vpop.permute.xlu1 %773  ;;  %v742_v33 = vadd.f32 %v700_v14, %v642_v26 }
 0x195   : > { %v3191_v17 = vadd.f32 %v774_v34, %v741_v31  ;;  %v887_v29 = vmul.f32 %v2715_v63, %v3157_v8 }
 0x197   : > { %2722 = vrsqrt.f32 %v3191_v17  ;;  %v889_v35 = vsel %vm888_vm11, %v3157_v8, %v887_v29  ;;  %v2717_v38 = vpop.eup %2716  ;;  %v776_v40 = vpop.permute.xlu0 %775  ;;  %vm916_vm2 = vcmp.eq.f32.partialorder %v3191_v17, inf  ;;  %vm918_vm4 = vcmp.eq.f32.partialorder %v3191_v17, 0.0 }
 0x198   : > { %v702_v44 = vpop.permute.xlu1 %701  ;;  %v892_v54 = vsel %vm890_vm12, %v891_v32, %v889_v35  ;;  %v3209_v23 = vadd.f32 %v776_v40, %v742_v33  ;;  %v894_v31 = vmul.f32 %v2717_v38, %v3164_v41  ;;  %v898_v32 = vand.u32 2147483648, %v3164_v41 }
 0x199   : > { %v974_v5 = vpack.c.bf16 %v892_v54, %v885_v47  ;;  %v743_v8 = vadd.f32 %v702_v44, %v644_v2  ;;  %v905_v33 = vand.u32 2147483648, %v3169_v57 }
 0x19a   : > { %2724 = vrsqrt.f32 %v3209_v23  ;;  %v896_v29 = vsel %vm895_vm13, %v3164_v41, %v894_v31  ;;  %vm923_vm5 = vcmp.eq.f32.partialorder %v3209_v23, inf  ;;  %vm925_vm6 = vcmp.eq.f32.partialorder %v3209_v23, 0.0 }
 0x19b   : > { %1002 = vrot.lane.b32.xlu0 %v974_v5, %s2829_s21  ;;  %v704_v14 = vpop.permute.xlu0 %703  ;;  %v899_v54 = vsel %vm897_vm14, %v898_v32, %v896_v29  ;;  %v919_v32 = vand.u32 2147483648, %v3191_v17 }
 0x19c   : > { %v2719_v63 = vpop.eup %2718  ;;  %v778_v34 = vpop.permute.xlu1 %777  ;;  %v744_v35 = vadd.f32 %v704_v14, %v646_v11 }
 0x19d   : > { %v3218_v26 = vadd.f32 %v778_v34, %v743_v8  ;;  %v901_v20 = vmul.f32 %v2719_v63, %v3169_v57  ;;  %v648_v8 = vmul.f32 %v3095_v27, %v3095_v27 }
 0x19f   : > { %2726 = vrsqrt.f32 %v3218_v26  ;;  %v903_v38 = vsel %vm902_vm15, %v3169_v57, %v901_v20  ;;  %v2721_v40 = vpop.eup %2720  ;;  %v782_v47 = vpop.permute.xlu0 %781  ;;  %v912_v20 = vand.u32 2147483648, %v3183_v60  ;;  %vm930_vm7 = vcmp.eq.f32.partialorder %v3218_v26, inf }
 0x1a0   : > { %v780_v44 = vpop.permute.xlu1 %779  ;;  %v906_v2 = vsel %vm904_vm0, %v905_v33, %v903_v38  ;;  %v908_v41 = vmul.f32 %v2721_v40, %v3183_v60  ;;  %vm932_vm8 = vcmp.eq.f32.partialorder %v3218_v26, 0.0 }
 0x1a1   : > { %v3231_v5 = vadd.f32 %v780_v44, %v744_v35  ;;  %v975_v31 = vpack.c.bf16 %v906_v2, %v899_v54 }
 0x1a2   : > { %v910_v11 = vsel %vm909_vm1, %v3183_v60, %v908_v41  ;;  %v616_v60 = vmul.f32 %v2974_v45, %v2974_v45 }
 0x1a3   : > { %2728 = vrsqrt.f32 %v3231_v5  ;;  %1004 = vrot.lane.b32.xlu1 %v975_v31, %s2829_s21  ;;  %v708_v57 = vpop.permute.xlu0 %707  ;;  %v913_v54 = vsel %vm911_vm3, %v912_v20, %v910_v11  ;;  %v614_v31 = vmul.f32 %v2966_v42, %v2966_v42  ;;  %v618_v11 = vmul.f32 %v2984_v48, %v2984_v48 }
 0x1a4   : > { %v2723_v63 = vpop.eup %2722  ;;  %v706_v34 = vpop.permute.xlu1 %705  ;;  %vm937_vm9 = vcmp.eq.f32.partialorder %v3231_v5, inf  ;;  %vm939_vm11 = vcmp.eq.f32.partialorder %v3231_v5, 0.0 }
 0x1a5   : > { %v745_v14 = vadd.f32 %v706_v34, %v648_v8  ;;  %v915_v29 = vmul.f32 %v2723_v63, %v3191_v17 }
 0x1a7   : > { %v3244_v33 = vadd.f32 %v782_v47, %v745_v14  ;;  %v917_v35 = vsel %vm916_vm2, %v3191_v17, %v915_v29  ;;  %v2725_v38 = vpop.eup %2724  ;;  %v676_v44 = vpop.permute.xlu0 %675  ;;  %v650_v47 = vmul.f32 %v3103_v30, %v3103_v30  ;;  %v728_v17 = vadd.f32 %v3126_v37, %v614_v31 }
 0x1a8   : > { %v678_v40 = vpop.permute.xlu1 %677  ;;  %v920_v2 = vsel %vm918_vm4, %v919_v32, %v917_v35  ;;  %v922_v8 = vmul.f32 %v2725_v38, %v3209_v23  ;;  %v729_v14 = vadd.f32 %v3131_v39, %v616_v60  ;;  %v933_v39 = vand.u32 2147483648, %v3218_v26 }
 0x1a9   : > { %2730 = vrsqrt.f32 %v3244_v33  ;;  %v976_v41 = vpack.c.bf16 %v920_v2, %v913_v54  ;;  %v746_v63 = vadd.f32 %v708_v57, %v650_v47  ;;  %v926_v57 = vand.u32 2147483648, %v3209_v23 }
 0x1aa   : > { %v924_v38 = vsel %vm923_vm5, %v3209_v23, %v922_v8  ;;  %v730_v54 = vadd.f32 %v676_v44, %v618_v11  ;;  %v620_v23 = vmul.f32 %v2990_v50, %v2990_v50  ;;  %vm944_vm10 = vcmp.eq.f32.partialorder %v3244_v33, inf }
 0x1ab   : > { %1006 = vrot.lane.b32.xlu0 %v976_v41, %s2829_s21  ;;  %v748_v20 = vpop.permute.xlu0 %747  ;;  %v927_v60 = vsel %vm925_vm6, %v926_v57, %v924_v38  ;;  %vm946_vm12 = vcmp.eq.f32.partialorder %v3244_v33, 0.0 }
 0x1ac   : > { %v2727_v34 = vpop.eup %2726  ;;  %v784_v29 = vpop.permute.xlu1 %783  ;;  %v3263_v35 = vadd.f32 %v748_v20, %v728_v17  ;;  %v731_v44 = vadd.f32 %v678_v40, %v620_v23  ;;  %v947_v40 = vand.u32 2147483648, %v3244_v33 }
 0x1ad   : > { %v822_v32 = vadd.f32 %v784_v29, %v746_v63  ;;  %v929_v37 = vmul.f32 %v2727_v34, %v3218_v26 }
 0x1ae   : > { %vm825_vm15 = vcmp.eq.f32.partialorder %v3263_v35, inf  ;;  %vm827_vm1 = vcmp.eq.f32.partialorder %v3263_v35, 0.0 }
 0x1af   : > { %2732 = vrsqrt.f32 %v822_v32  ;;  %v931_v2 = vsel %vm930_vm7, %v3218_v26, %v929_v37  ;;  %v752_v41 = vpop.permute.xlu0 %751  ;;  %v940_v37 = vand.u32 2147483648, %v3231_v5  ;;  %vm951_vm13 = vcmp.eq.f32.partialorder %v822_v32, inf }
 0x1b0   : > { %v2729_v31 = vpop.eup %2728  ;;  %2734 = vrsqrt.f32 %v3263_v35  ;;  %v750_v47 = vpop.permute.xlu1 %749  ;;  %v934_v8 = vsel %vm932_vm8, %v933_v39, %v931_v2  ;;  %v3276_v63 = vadd.f32 %v752_v41, %v730_v54  ;;  %vm953_vm14 = vcmp.eq.f32.partialorder %v822_v32, 0.0 }
 0x1b1   : > { %v805_v17 = vadd.f32 %v750_v47, %v729_v14  ;;  %v977_v34 = vpack.c.bf16 %v934_v8, %v927_v60  ;;  %v936_v26 = vmul.f32 %v2729_v31, %v3231_v5  ;;  %v954_v60 = vand.u32 2147483648, %v822_v32 }
 0x1b2   : > { %vm839_vm3 = vcmp.eq.f32.partialorder %v3276_v63, inf  ;;  %vm841_vm5 = vcmp.eq.f32.partialorder %v3276_v63, 0.0  ;;  %vm1026_vm7 = vcmask 261120   ;;  %vm2246_vm8 = vcmask 523264  }
 0x1b3   : > { %2736 = vrsqrt.f32 %v805_v17  ;;  %1008 = vrot.lane.b32.xlu1 %v977_v34, %s2829_s21  ;;  %v938_v38 = vsel %vm937_vm9, %v3231_v5, %v936_v26  ;;  %vm832_vm0 = vcmp.eq.f32.partialorder %v805_v17, inf  ;;  %vm834_vm2 = vcmp.eq.f32.partialorder %v805_v17, 0.0 }
 0x1b4   : > { %2738 = vrsqrt.f32 %v3276_v63  ;;  %v754_v11 = vpop.permute.xlu1 %753  ;;  %v941_v39 = vsel %vm939_vm11, %v940_v37, %v938_v38  ;;  %v835_v38 = vand.u32 2147483648, %v805_v17 }
 0x1b5   : > { %v807_v29 = vadd.f32 %v754_v11, %v731_v44 }
 0x1b6   : > { %v2731_v20 = vpop.eup %2730 }
 0x1b7   : > { %2740 = vrsqrt.f32 %v807_v29  ;;  %v943_v14 = vmul.f32 %v2731_v20, %v3244_v33  ;;  %v828_v20 = vand.u32 2147483648, %v3263_v35  ;;  %vm846_vm4 = vcmp.eq.f32.partialorder %v807_v29, inf }
 0x1b8   : > { %vm848_vm6 = vcmp.eq.f32.partialorder %v807_v29, 0.0 }
 0x1b9   : > { %v945_v57 = vsel %vm944_vm10, %v3244_v33, %v943_v14 }
 0x1ba   : > { %v948_v54 = vsel %vm946_vm12, %v947_v40, %v945_v57 }
 0x1bb   : > { %v978_v2 = vpack.c.bf16 %v948_v54, %v941_v39 }
 0x1bc   : > { %v2733_v31 = vpop.eup %2732 }
 0x1bd   : > { %v2735_v47 = vpop.eup %2734  ;;  %1010 = vrot.lane.b32.xlu0 %v978_v2, %s2829_s21  ;;  %v950_v41 = vmul.f32 %v2733_v31, %v822_v32  ;;  %v842_v31 = vand.u32 2147483648, %v3276_v63 }
 0x1be   : > { %v824_v8 = vmul.f32 %v2735_v47, %v3263_v35  ;;  %v849_v47 = vand.u32 2147483648, %v807_v29 }
 0x1bf   : > { %v952_v23 = vsel %vm951_vm13, %v822_v32, %v950_v41 }
 0x1c0   : > { %v2737_v34 = vpop.eup %2736  ;;  %v955_v5 = vsel %vm953_vm14, %v954_v60, %v952_v23  ;;  %v826_v26 = vsel %vm825_vm15, %v3263_v35, %v824_v8  ;;  %v357_v23 = vld [vmem:[%s3394_s30 + $0x30] sm:$0xff] }
 0x1c1   : > { %v2739_v44 = vpop.eup %2738  ;;  %v979_v33 = vpack.c.bf16 %v955_v5, %v955_v5  ;;  %v831_v11 = vmul.f32 %v2737_v34, %v805_v17  ;;  %v829_v40 = vsel %vm827_vm1, %v828_v20, %v826_v26  ;;  %v358_v34 = vld [vmem:[%s3394_s30 + $0x38] sm:$0xff]  ;;  %v359_v5 = vld [vmem:[%s3394_s30 + $0x40] sm:$0xff] }
 0x1c2   : > { %v838_v14 = vmul.f32 %v2739_v44, %v3276_v63  ;;  %v360_v44 = vld [vmem:[%s3394_s30 + $0x48] sm:$0xff]  ;;  %v959_v20 = vpack.c.bf16 %v358_v34, %v357_v23 }
 0x1c3   : > { %1012 = vrot.lane.b32.xlu1 %v979_v33, %s2829_s21  ;;  %v833_v32 = vsel %vm832_vm0, %v805_v17, %v831_v11 }
 0x1c4   : > { %v2741_v37 = vpop.eup %2740  ;;  %v836_v57 = vsel %vm834_vm2, %v835_v38, %v833_v32  ;;  %v840_v54 = vsel %vm839_vm3, %v3276_v63, %v838_v14  ;;  %v960_v14 = vpack.c.bf16 %v360_v44, %v359_v5 }
 0x1c5   : > { %v970_v39 = vpack.c.bf16 %v836_v57, %v829_v40  ;;  %v845_v2 = vmul.f32 %v2741_v37, %v807_v29  ;;  %v843_v17 = vsel %vm841_vm5, %v842_v31, %v840_v54  ;;  %v362_v54 = vld [vmem:[%s3394_s30 + $0x58] sm:$0xff]  ;;  %v364_v31 = vld [vmem:[%s3394_s30 + $0x68] sm:$0xff] }
 0x1c7   : > { %994 = vrot.lane.b32.xlu0 %v970_v39, %s2829_s21  ;;  %v847_v35 = vsel %vm846_vm4, %v807_v29, %v845_v2  ;;  %v361_v39 = vld [vmem:[%s3394_s30 + $0x50] sm:$0xff]  ;;  %v363_v2 = vld [vmem:[%s3394_s30 + $0x60] sm:$0xff] }
 0x1c8   : > { %v850_v41 = vsel %vm848_vm6, %v849_v47, %v847_v35 }
 0x1c9   : > { %v971_v60 = vpack.c.bf16 %v850_v41, %v843_v17  ;;  %v961_v41 = vpack.c.bf16 %v362_v54, %v361_v39 }
 0x1cb   : > { %1695 = vrot.lane.b32.xlu0 %v2966_v42, %s2829_s21  ;;  %996 = vrot.lane.b32.xlu1 %v971_v60, %s2829_s21 }
 0x1cf   : > { %1699 = vrot.lane.b32.xlu0 %v2974_v45, %s2829_s21  ;;  %1697 = vrot.lane.b32.xlu1 %v2968_v43, %s2829_s21 }
 0x1d3   : > { %1703 = vrot.lane.b32.xlu0 %v2984_v48, %s2829_s21  ;;  %1701 = vrot.lane.b32.xlu1 %v2978_v46, %s2829_s21 }
 0x1d7   : > { %1707 = vrot.lane.b32.xlu0 %v2990_v50, %s2829_s21  ;;  %1705 = vrot.lane.b32.xlu1 %v2988_v49, %s2829_s21  ;;  %v2701_v49 = vld [vmem:[%s4232_s3] sm:$0xff]  }
 0x1db   : > { %1711 = vrot.lane.b32.xlu0 %v2994_v52, %s2829_s21  ;;  %1709 = vrot.lane.b32.xlu1 %v2992_v51, %s2829_s21 }
 0x1df   : > { %1715 = vrot.lane.b32.xlu0 %v3000_v55, %s2829_s21  ;;  %1713 = vrot.lane.b32.xlu1 %v2996_v53, %s2829_s21 }
 0x1e3   : > { %1719 = vrot.lane.b32.xlu0 %v3007_v58, %s2829_s21  ;;  %1717 = vrot.lane.b32.xlu1 %v3003_v56, %s2829_s21  ;;  %v4276_v56 = vld [vmem:[#allocation15_spill] sm:$0xff] }
 0x1e7   : > { %1723 = vrot.lane.b32.xlu0 %v3015_v61, %s2829_s21  ;;  %1721 = vrot.lane.b32.xlu1 %v3011_v59, %s2829_s21 }
 0x1eb   : > { %1727 = vrot.lane.b32.xlu0 %v3023_v0, %s2829_s21  ;;  %1725 = vrot.lane.b32.xlu1 %v3019_v62, %s2829_s21 }
 0x1ef   : > { %1731 = vrot.lane.b32.xlu0 %v3031_v3, %s2829_s21  ;;  %1729 = vrot.lane.b32.xlu1 %v3027_v1, %s2829_s21 }
 0x1f3   : > { %1735 = vrot.lane.b32.xlu0 %v3039_v6, %s2829_s21  ;;  %1733 = vrot.lane.b32.xlu1 %v3035_v4, %s2829_s21  ;;  %v351_v4 = vld [vmem:[%s3394_s30] sm:$0xff] }
 0x1f7   : > { %1739 = vrot.lane.b32.xlu0 %v3047_v9, %s2829_s21  ;;  %1737 = vrot.lane.b32.xlu1 %v3043_v7, %s2829_s21  ;;  %v352_v7 = vld [vmem:[%s3394_s30 + $0x8] sm:$0xff] }
 0x1fb   : > { %1743 = vrot.lane.b32.xlu0 %v3055_v12, %s2829_s21  ;;  %1741 = vrot.lane.b32.xlu1 %v3051_v10, %s2829_s21  ;;  %v956_v10 = vpack.c.bf16 %v352_v7, %v351_v4 }
 0x1fe   : > { %v999_v43 = vpop.permute.xlu0 %998 }
 0x1ff   : > { %1747 = vrot.lane.b32.xlu0 %v3063_v15, %s2829_s21  ;;  %1745 = vrot.lane.b32.xlu1 %v3059_v13, %s2829_s21 }
 0x200   : > { %2600 = vmatprep.mubr.msk.bf16.mxu1 %vm1026_vm7, %v999_v43  ;;  %v962_v43 = vpack.c.bf16 %v364_v31, %v363_v2 }
 0x203   : > { %1751 = vrot.lane.b32.xlu0 %v3071_v18, %s2829_s21  ;;  %1749 = vrot.lane.b32.xlu1 %v3067_v16, %s2829_s21  ;;  %v353_v16 = vld [vmem:[%s3394_s30 + $0x10] sm:$0xff] }
 0x204   : > { %v1001_v46 = vpop.permute.xlu1 %1000 }
 0x205   : > { %2601 = vmatmul.mubr.msk.bf16.vlgmr.msra.gmra.mxu1 %vm1026_vm7, %v1001_v46 }
 0x206   : > { %2617 = vmatpush3.bf16.msra.mxu1 %v3207_v36 }
 0x207   : > { %1755 = vrot.lane.b32.xlu0 %v3079_v21, %s2829_s21  ;;  %1753 = vrot.lane.b32.xlu1 %v3075_v19, %s2829_s21  ;;  %v354_v19 = vld [vmem:[%s3394_s30 + $0x18] sm:$0xff] }
 0x208   : > { %2618 = vmatprep.subr.bf16.mxu1 %v2701_v49  ;;  %v957_v36 = vpack.c.bf16 %v354_v19, %v353_v16 }
 0x20a   : > { %2619 = vmatpush3.bf16.msra.mxu1 %v2701_v49 }
 0x20b   : > { %1759 = vrot.lane.b32.xlu0 %v3087_v24, %s2829_s21  ;;  %1757 = vrot.lane.b32.xlu1 %v3083_v22, %s2829_s21  ;;  %v355_v22 = vld [vmem:[%s3394_s30 + $0x20] sm:$0xff] }
 0x20d   : > { %v1003_v51 = vpop.permute.xlu0 %1002 }
 0x20e   : > { %2604 = vmatprep.mubr.msk.bf16.mxu1 %vm1026_vm7, %v1003_v51 }
 0x20f   : > { %1763 = vrot.lane.b32.xlu0 %v3095_v27, %s2829_s21  ;;  %1761 = vrot.lane.b32.xlu1 %v3091_v25, %s2829_s21  ;;  %v356_v25 = vld [vmem:[%s3394_s30 + $0x28] sm:$0xff] }
 0x210   : > { %v958_v63 = vpack.c.bf16 %v356_v25, %v355_v22 }
 0x213   : > { %1767 = vrot.lane.b32.xlu0 %v3103_v30, %s2829_s21  ;;  %1765 = vrot.lane.b32.xlu1 %v3099_v28, %s2829_s21 }
 0x215   : > { %v1005_v53 = vpop.permute.xlu1 %1004 }
 0x216   : > { %2605 = vmatmul.mubr.msk.bf16.gmra.mxu1 %vm1026_vm7, %v1005_v53 }
 0x217   : > { %1769 = vrot.lane.b32.xlu1 %v4276_v56, %s2829_s21  ;;  %v365_v56 = vld [vmem:[%s3394_s30 + $0x70] sm:$0xff] }
 0x21d   : > { %v1007_v59 = vpop.permute.xlu0 %1006 }
 0x21e   : > { %2608 = vmatprep.mubr.msk.bf16.mxu1 %vm1026_vm7, %v1007_v59  ;;  %v366_v59 = vld [vmem:[%s3394_s30 + $0x78] sm:$0xff] }
 0x225   : > { %v1009_v62 = vpop.permute.xlu1 %1008 }
 0x226   : > { %2609 = vmatmul.mubr.msk.bf16.gmra.mxu1 %vm1026_vm7, %v1009_v62  ;;  %v367_v62 = vld [vmem:[%s3394_s30 + $0x80] sm:$0xff] }
 0x22f   : > { %v1011_v1 = vpop.permute.xlu0 %1010 }
 0x230   : > { %2612 = vmatprep.mubr.msk.bf16.mxu1 %vm1026_vm7, %v1011_v1  ;;  %v368_v1 = vld [vmem:[%s3394_s30 + $0x88] sm:$0xff] }
 0x231   : > { %v964_v19 = vpack.c.bf16 %v368_v1, %v367_v62 }
 0x235   : > { %v1013_v13 = vpop.permute.xlu1 %1012 }
 0x236   : > { %2613 = vmatmul.mubr.msk.bf16.gmra.mxu1 %vm1026_vm7, %v1013_v13  ;;  %v963_v13 = vpack.c.bf16 %v366_v59, %v365_v56 }
 0x237   : > { %2620 = vmatprep.mubr.msk.bf16.mxu1 %vm1026_vm7, %v956_v10 }
 0x239   : > { %v995_v28 = vpop.permute.xlu0 %994 }
 0x23a   : > { %2596 = vmatprep.mubr.msk.bf16.mxu0 %vm1026_vm7, %v995_v28 }
 0x23d   : > { %v997_v29 = vpop.permute.xlu1 %996  ;;  %v1696_v8 = vpop.permute.xlu0 %1695 }
 0x23e   : > { %2597 = vmatmul.mubr.msk.bf16.vlgmr.msra.gmra.mxu0 %vm1026_vm7, %v997_v29  ;;  %2621 = vmatmul.mubr.msk.bf16.vlgmr.msra.gmra.mxu1 %vm1026_vm7, %v957_v36 }
 0x23f   : > { %2624 = vmatprep.mubr.msk.bf16.mxu1 %vm1026_vm7, %v958_v63  ;;  %v369_v63 = vld [vmem:[%s3394_s30 + $0x90] sm:$0xff] }
 0x240   : > { %v965_v34 = vpack.c.bf16 %v369_v63, %v369_v63 }
 0x241   : > { %v1698_v33 = vpop.permute.xlu1 %1697  ;;  %v1700_v26 = vpop.permute.xlu0 %1699 }
 0x242   : > { %v1771_v11 = vsel %vm1026_vm7, %v1696_v8, %v1698_v33 }
 0x243   : > { %v3415_v38 = vmul.f32 %v1771_v11, %v2966_v42 }
 0x245   : > { %v1702_v32 = vpop.permute.xlu1 %1701  ;;  %1847 = vrot.lane.b32.xlu0 %v3415_v38, %s2827_s15  ;;  %v1704_v37 = vpop.permute.xlu0 %1703 }
 0x246   : > { %v1772_v40 = vsel %vm1026_vm7, %v1700_v26, %v1702_v32  ;;  %2625 = vmatmul.mubr.msk.bf16.gmra.mxu1 %vm1026_vm7, %v959_v20 }
 0x247   : > { %v3422_v57 = vmul.f32 %v1772_v40, %v2974_v45  ;;  %2628 = vmatprep.mubr.msk.bf16.mxu1 %vm1026_vm7, %v960_v14 }
 0x249   : > { %v1706_v47 = vpop.permute.xlu1 %1705  ;;  %1849 = vrot.lane.b32.xlu1 %v3422_v57, %s2827_s15  ;;  %v1708_v35 = vpop.permute.xlu0 %1707 }
 0x24a   : > { %v1773_v17 = vsel %vm1026_vm7, %v1704_v37, %v1706_v47 }
 0x24b   : > { %v3433_v60 = vmul.f32 %v1773_v17, %v2984_v48 }
 0x24d   : > { %v1710_v46 = vpop.permute.xlu1 %1709  ;;  %1851 = vrot.lane.b32.xlu0 %v3433_v60, %s2827_s15  ;;  %v1712_v49 = vpop.permute.xlu0 %1711 }
 0x24e   : > { %v1774_v51 = vsel %vm1026_vm7, %v1708_v35, %v1710_v46  ;;  %2629 = vmatmul.mubr.msk.bf16.gmra.mxu1 %vm1026_vm7, %v961_v41 }
 0x24f   : > { %v3440_v53 = vmul.f32 %v1774_v51, %v2990_v50  ;;  %2632 = vmatprep.mubr.msk.bf16.mxu1 %vm1026_vm7, %v962_v43 }
 0x251   : > { %v1714_v4 = vpop.permute.xlu1 %1713  ;;  %1853 = vrot.lane.b32.xlu1 %v3440_v53, %s2827_s15  ;;  %v1716_v7 = vpop.permute.xlu0 %1715 }
 0x252   : > { %v1775_v10 = vsel %vm1026_vm7, %v1712_v49, %v1714_v4 }
 0x253   : > { %v3451_v16 = vmul.f32 %v1775_v10, %v2994_v52 }
 0x255   : > { %v1718_v22 = vpop.permute.xlu1 %1717  ;;  %1855 = vrot.lane.b32.xlu0 %v3451_v16, %s2827_s15  ;;  %v1720_v25 = vpop.permute.xlu0 %1719 }
 0x256   : > { %v1776_v28 = vsel %vm1026_vm7, %v1716_v7, %v1718_v22  ;;  %2633 = vmatmul.mubr.msk.bf16.gmra.mxu1 %vm1026_vm7, %v963_v13 }
 0x257   : > { %v3458_v36 = vmul.f32 %v1776_v28, %v3000_v55  ;;  %2636 = vmatprep.mubr.msk.bf16.mxu1 %vm1026_vm7, %v964_v19 }
 0x259   : > { %v1722_v29 = vpop.permute.xlu1 %1721  ;;  %1857 = vrot.lane.b32.xlu1 %v3458_v36, %s2827_s15  ;;  %v1724_v8 = vpop.permute.xlu0 %1723 }
 0x25a   : > { %v1777_v23 = vsel %vm1026_vm7, %v1720_v25, %v1722_v29 }
 0x25b   : > { %v3466_v5 = vmul.f32 %v1777_v23, %v3007_v58 }
 0x25d   : > { %v1726_v44 = vpop.permute.xlu1 %1725  ;;  %1859 = vrot.lane.b32.xlu0 %v3466_v5, %s2827_s15  ;;  %v1728_v33 = vpop.permute.xlu0 %1727 }
 0x25e   : > { %v1778_v26 = vsel %vm1026_vm7, %v1724_v8, %v1726_v44  ;;  %2637 = vmatmul.mubr.msk.bf16.gmra.mxu1 %vm1026_vm7, %v965_v34 }
 0x25f   : > { %v3473_v11 = vmul.f32 %v1778_v26, %v3015_v61 }
 0x261   : > { %v1730_v20 = vpop.permute.xlu1 %1729  ;;  %1861 = vrot.lane.b32.xlu1 %v3473_v11, %s2827_s15  ;;  %v1732_v14 = vpop.permute.xlu0 %1731 }
 0x262   : > { %v1779_v32 = vsel %vm1026_vm7, %v1728_v33, %v1730_v20 }
 0x263   : > { %v3479_v37 = vmul.f32 %v1779_v32, %v3023_v0 }
 0x265   : > { %4277 = vst [vmem:[#allocation15_spill] sm:$0xff] %v3479_v37  ;;  %v1734_v40 = vpop.permute.xlu1 %1733  ;;  %1863 = vrot.lane.b32.xlu0 %v3479_v37, %s2827_s15  ;;  %v1736_v39 = vpop.permute.xlu0 %1735 }
 0x266   : > { %v1780_v54 = vsel %vm1026_vm7, %v1732_v14, %v1734_v40 }
 0x267   : > { %v3485_v2 = vmul.f32 %v1780_v54, %v3031_v3 }
 0x269   : > { %4278 = vst [vmem:[#allocation16_spill] sm:$0xff] %v3485_v2  ;;  %v1738_v31 = vpop.permute.xlu1 %1737  ;;  %1865 = vrot.lane.b32.xlu1 %v3485_v2, %s2827_s15  ;;  %v1740_v47 = vpop.permute.xlu0 %1739 }
 0x26a   : > { %v1781_v35 = vsel %vm1026_vm7, %v1736_v39, %v1738_v31  ;;  %v2702_v31 = vld [vmem:[%s4235_s6 + $0x8] sm:$0xff]  }
 0x26b   : > { %v3491_v17 = vmul.f32 %v1781_v35, %v3039_v6  ;;  %2640 = vmatprep.subr.bf16.mxu1 %v2702_v31 }
 0x26c   : > { %2641 = vmatpush3.bf16.msra.mxu1 %v2702_v31 }
 0x26d   : > { %4279 = vst [vmem:[#allocation17_spill] sm:$0xff] %v3491_v17  ;;  %v1742_v41 = vpop.permute.xlu1 %1741  ;;  %1867 = vrot.lane.b32.xlu0 %v3491_v17, %s2827_s15  ;;  %v1744_v43 = vpop.permute.xlu0 %1743 }
 0x26e   : > { %v1782_v46 = vsel %vm1026_vm7, %v1740_v47, %v1742_v41  ;;  %v2703_v47 = vld [vmem:[%s4235_s6] sm:$0xff]  }
 0x26f   : > { %v3497_v49 = vmul.f32 %v1782_v46, %v3047_v9  ;;  %2642 = vmatprep.subr.bf16.mxu1 %v2703_v47 }
 0x270   : > { %2643 = vmatpush3.bf16.msra.mxu1 %v2703_v47 }
 0x271   : > { %4280 = vst [vmem:[#allocation18_spill] sm:$0xff] %v3497_v49  ;;  %v1746_v51 = vpop.permute.xlu1 %1745  ;;  %1869 = vrot.lane.b32.xlu1 %v3497_v49, %s2827_s15  ;;  %v1748_v56 = vpop.permute.xlu0 %1747 }
 0x272   : > { %v1783_v59 = vsel %vm1026_vm7, %v1744_v43, %v1746_v51 }
 0x273   : > { %v3503_v62 = vmul.f32 %v1783_v59, %v3055_v12 }
 0x275   : > { %4281 = vst [vmem:[#allocation19_spill] sm:$0xff] %v3503_v62  ;;  %v1750_v1 = vpop.permute.xlu1 %1749  ;;  %1871 = vrot.lane.b32.xlu0 %v3503_v62, %s2827_s15  ;;  %v1752_v4 = vpop.permute.xlu0 %1751 }
 0x276   : > { %v1784_v7 = vsel %vm1026_vm7, %v1748_v56, %v1750_v1 }
 0x277   : > { %v3509_v10 = vmul.f32 %v1784_v7, %v3063_v15 }
 0x279   : > { %4282 = vst [vmem:[#allocation20_spill] sm:$0xff] %v3509_v10  ;;  %v1754_v13 = vpop.permute.xlu1 %1753  ;;  %1873 = vrot.lane.b32.xlu1 %v3509_v10, %s2827_s15  ;;  %v1756_v19 = vpop.permute.xlu0 %1755 }
 0x27a   : > { %v1785_v22 = vsel %vm1026_vm7, %v1752_v4, %v1754_v13 }
 0x27b   : > { %v3515_v25 = vmul.f32 %v1785_v22, %v3071_v18 }
 0x27d   : > { %4283 = vst [vmem:[#allocation21_spill] sm:$0xff] %v3515_v25  ;;  %v1758_v28 = vpop.permute.xlu1 %1757  ;;  %1875 = vrot.lane.b32.xlu0 %v3515_v25, %s2827_s15  ;;  %v1760_v63 = vpop.permute.xlu0 %1759 }
 0x27e   : > { %v1786_v29 = vsel %vm1026_vm7, %v1756_v19, %v1758_v28 }
 0x27f   : > { %v3521_v8 = vmul.f32 %v1786_v29, %v3079_v21 }
 0x281   : > { %4284 = vst [vmem:[#allocation22_spill] sm:$0xff] %v3521_v8  ;;  %v1762_v23 = vpop.permute.xlu1 %1761  ;;  %1877 = vrot.lane.b32.xlu1 %v3521_v8, %s2827_s15  ;;  %v1764_v33 = vpop.permute.xlu0 %1763 }
 0x282   : > { %v1787_v34 = vsel %vm1026_vm7, %v1760_v63, %v1762_v23 }
 0x283   : > { %v3527_v44 = vmul.f32 %v1787_v34, %v3087_v24 }
 0x285   : > { %v1766_v26 = vpop.permute.xlu1 %1765  ;;  %1879 = vrot.lane.b32.xlu0 %v3527_v44, %s2827_s15  ;;  %v1768_v32 = vpop.permute.xlu0 %1767 }
 0x286   : > { %v1788_v20 = vsel %vm1026_vm7, %v1764_v33, %v1766_v26 }
 0x287   : > { %v3533_v14 = vmul.f32 %v1788_v20, %v3095_v27 }
 0x289   : > { %4285 = vst [vmem:[#allocation23_spill] sm:$0xff] %v3533_v14  ;;  %v1770_v40 = vpop.permute.xlu1 %1769  ;;  %1881 = vrot.lane.b32.xlu1 %v3533_v14, %s2827_s15 }
 0x28a   : > { %v1789_v39 = vsel %vm1026_vm7, %v1768_v32, %v1770_v40 }
 0x28b   : > { %v3539_v54 = vmul.f32 %v1789_v39, %v3103_v30  ;;  %v3636_v30 = vld [vmem:[%s4234_s5] ss:$0 sm:$0xff] }
 0x28d   : > { %4286 = vst [vmem:[#allocation24_spill] sm:$0xff] %v3539_v54  ;;  %1923 = vrot.lane.b32.xlu1 %v3415_v38, %s2828_s16  ;;  %1883 = vrot.lane.b32.xlu0 %v3539_v54, %s2827_s15 }
 0x291   : > { %1927 = vrot.lane.b32.xlu1 %v3433_v60, %s2828_s16  ;;  %1925 = vrot.lane.b32.xlu0 %v3422_v57, %s2828_s16 }
 0x295   : > { %1931 = vrot.lane.b32.xlu1 %v3451_v16, %s2828_s16  ;;  %1929 = vrot.lane.b32.xlu0 %v3440_v53, %s2828_s16 }
 0x299   : > { %1935 = vrot.lane.b32.xlu1 %v3466_v5, %s2828_s16  ;;  %1933 = vrot.lane.b32.xlu0 %v3458_v36, %s2828_s16 }
 0x29d   : > { %1939 = vrot.lane.b32.xlu1 %v3479_v37, %s2828_s16  ;;  %1937 = vrot.lane.b32.xlu0 %v3473_v11, %s2828_s16 }
 0x2a1   : > { %1943 = vrot.lane.b32.xlu1 %v3491_v17, %s2828_s16  ;;  %1941 = vrot.lane.b32.xlu0 %v3485_v2, %s2828_s16 }
 0x2a5   : > { %1947 = vrot.lane.b32.xlu1 %v3503_v62, %s2828_s16  ;;  %1945 = vrot.lane.b32.xlu0 %v3497_v49, %s2828_s16 }
 0x2a9   : > { %1951 = vrot.lane.b32.xlu1 %v3515_v25, %s2828_s16  ;;  %1949 = vrot.lane.b32.xlu0 %v3509_v10, %s2828_s16 }
 0x2ad   : > { %1955 = vrot.lane.b32.xlu1 %v3527_v44, %s2828_s16  ;;  %1953 = vrot.lane.b32.xlu0 %v3521_v8, %s2828_s16 }
 0x2b1   : > { %1959 = vrot.lane.b32.xlu1 %v3539_v54, %s2828_s16  ;;  %1957 = vrot.lane.b32.xlu0 %v3533_v14, %s2828_s16 }
 0x2b7   : > { %v3627_v39 = vpop.permute.xlu0 %1847 }
 0x2bb   : > { %v3593_v56 = vpop.permute.xlu1 %1849 }
 0x2bf   : > { %v3638_v14 = vpop.permute.xlu0 %1851 }
 0x2c3   : > { %v3597_v1 = vpop.permute.xlu1 %1853 }
 0x2c5   : > { %v2602_v35 = vpop.f32.mrf.mxu1 }
 0x2c7   : > { %v1107_v41 = vpop.f32.mrf.mxu1  ;;  %v3645_v18 = vpop.permute.xlu0 %1855 }
 0x2c9   : > { %v3587_v43 = vpop.f32.mrf.mxu1 }
 0x2cb   : > { %v3589_v46 = vpop.f32.mrf.mxu1  ;;  %v3601_v7 = vpop.permute.xlu1 %1857 }
 0x2cf   : > { %v3657_v9 = vpop.permute.xlu0 %1859 }
 0x2d3   : > { %v3605_v19 = vpop.permute.xlu1 %1861 }
 0x2d6   : > { %v3591_v51 = vpop.f32.mrf.mxu1 }
 0x2d7   : > { %v3669_v2 = vpop.permute.xlu0 %1863 }
 0x2d8   : > { %v3595_v59 = vpop.f32.mrf.mxu1  ;;  %4292 = vst [vmem:[#allocation30_spill] sm:$0xff] %v3669_v2 }
 0x2da   : > { %v3599_v4 = vpop.f32.mrf.mxu1 }
 0x2db   : > { %v3609_v28 = vpop.permute.xlu1 %1865 }
 0x2dc   : > { %v3603_v13 = vpop.f32.mrf.mxu1  ;;  %4287 = vst [vmem:[#allocation25_spill] sm:$0xff] %v3609_v28 }
 0x2e3   : > { %v3613_v29 = vpop.permute.xlu1 %1869 }
 0x2e4   : > { %4288 = vst [vmem:[#allocation26_spill] sm:$0xff] %v3613_v29 }
 0x2e6   : > { %v3607_v22 = vpop.f32.mrf.mxu1 }
 0x2e8   : > { %v3611_v63 = vpop.f32.mrf.mxu1 }
 0x2ea   : > { %v3615_v23 = vpop.f32.mrf.mxu1 }
 0x2eb   : > { %v3617_v34 = vpop.permute.xlu1 %1873 }
 0x2ec   : > { %4289 = vst [vmem:[#allocation27_spill] sm:$0xff] %v3617_v34  ;;  %v3619_v33 = vpop.f32.mrf.mxu1 }
 0x2f3   : > { %v3623_v20 = vpop.permute.xlu1 %1877 }
 0x2f4   : > { %4290 = vst [vmem:[#allocation28_spill] sm:$0xff] %v3623_v20 }
 0x2f6   : > { %v3621_v26 = vpop.f32.mrf.mxu1 }
 0x2f8   : > { %v3625_v32 = vpop.f32.mrf.mxu1 }
 0x2fa   : > { %v2615_v40 = vpop.f32.mrf.mxu1 }
 0x2fb   : > { %v3629_v31 = vpop.permute.xlu1 %1881 }
 0x2fc   : > { %4291 = vst [vmem:[#allocation29_spill] sm:$0xff] %v3629_v31  ;;  %v3631_v47 = vpop.f32.mrf.mxu1 }
 0x2fe   : > { %v2598_v54 = vpop.f32.mrf.mxu0  ;;  %v2622_v27 = vpop.f32.mrf.mxu1 }
 0x2ff   : > { %v1254_v24 = vadd.f32 %v2622_v27, %v2598_v54  ;;  %v3640_v15 = vpop.permute.xlu1 %1923 }
 0x300   : > { %v1091_v21 = vpop.f32.mrf.mxu0  ;;  %v1245_v40 = vpop.f32.mrf.mxu1 }
 0x301   : > { %v3643_v12 = vadd.f32 %v3636_v30, %v1254_v24  ;;  %v1246_v31 = vadd.f32 %v1245_v40, %v1091_v21 }
 0x302   : > { %v2599_v34 = vpop.f32.mrf.mxu0  ;;  %v2623_v10 = vpop.f32.mrf.mxu1 }
 0x303   : > { %v2524_v20 = vmul.f32 -1.442695, %v3643_v12  ;;  %v3649_v8 = vadd.f32 %v3636_v30, %v1246_v31  ;;  %v1257_v62 = vadd.f32 %v2623_v10, %v2599_v34  ;;  %v3651_v3 = vpop.permute.xlu1 %1927 }
 0x304   : > { %v1094_v27 = vpop.f32.mrf.mxu0  ;;  %v1248_v54 = vpop.f32.mrf.mxu1 }
 0x305   : > { %2742 = vpow2.f32 %v2524_v20  ;;  %v2522_v25 = vmul.f32 -1.442695, %v3649_v8  ;;  %v3655_v24 = vadd.f32 %v3636_v30, %v1257_v62  ;;  %v1249_v21 = vadd.f32 %v1248_v54, %v1094_v27 }
 0x306   : > { %v2626_v40 = vpop.f32.mrf.mxu1 }
 0x307   : > { %2744 = vpow2.f32 %v2522_v25  ;;  %v2525_v0 = vmul.f32 -1.442695, %v3655_v24  ;;  %v3661_v31 = vadd.f32 %v3636_v30, %v1249_v21  ;;  %v1270_v10 = vadd.f32 %v2626_v40, %v2602_v35  ;;  %v3663_v34 = vpop.permute.xlu1 %1931 }
 0x308   : > { %v1261_v28 = vpop.f32.mrf.mxu1 }
 0x309   : > { %2746 = vpow2.f32 %v2525_v0  ;;  %v2523_v20 = vmul.f32 -1.442695, %v3661_v31  ;;  %v3667_v62 = vadd.f32 %v3636_v30, %v1270_v10  ;;  %v1262_v27 = vadd.f32 %v1261_v28, %v1107_v41 }
 0x30a   : > { %v2627_v54 = vpop.f32.mrf.mxu1 }
 0x30b   : > { %2748 = vpow2.f32 %v2523_v20  ;;  %v2528_v25 = vmul.f32 -1.442695, %v3667_v62  ;;  %v3673_v21 = vadd.f32 %v3636_v30, %v1262_v27  ;;  %v1273_v35 = vadd.f32 %v2627_v54, %v3587_v43  ;;  %v3676_v40 = vpop.permute.xlu1 %1935  ;;  %v3683_v20 = vpop.permute.xlu0 %1867 }
 0x30c   : > { %v1264_v0 = vpop.f32.mrf.mxu1  ;;  %4293 = vst [vmem:[#allocation31_spill] sm:$0xff] %v3683_v20 }
 0x30d   : > { %2750 = vpow2.f32 %v2528_v25  ;;  %v2526_v6 = vmul.f32 -1.442695, %v3673_v21  ;;  %v3680_v10 = vadd.f32 %v3636_v30, %v1273_v35  ;;  %v1265_v41 = vadd.f32 %v1264_v0, %v3589_v46 }
 0x30e   : > { %v2630_v28 = vpop.f32.mrf.mxu1 }
 0x30f   : > { %2752 = vpow2.f32 %v2526_v6  ;;  %v2529_v27 = vmul.f32 -1.442695, %v3680_v10  ;;  %v3687_v29 = vadd.f32 %v3636_v30, %v1265_v41  ;;  %v1286_v43 = vadd.f32 %v2630_v28, %v3591_v51  ;;  %v3690_v54 = vpop.permute.xlu1 %1939  ;;  %v3697_v2 = vpop.permute.xlu0 %1871 }
 0x310   : > { %4294 = vst [vmem:[#allocation32_spill] sm:$0xff] %v3690_v54  ;;  %v1277_v25 = vpop.f32.mrf.mxu1  ;;  %4295 = vst [vmem:[#allocation33_spill] sm:$0xff] %v3697_v2 }
 0x311   : > { %2754 = vpow2.f32 %v2529_v27  ;;  %v2527_v35 = vmul.f32 -1.442695, %v3687_v29  ;;  %v3694_v49 = vadd.f32 %v3636_v30, %v1286_v43  ;;  %v1278_v46 = vadd.f32 %v1277_v25, %v3595_v59 }
 0x312   : > { %v2743_v0 = vpop.eup %2742  ;;  %v2631_v6 = vpop.f32.mrf.mxu1 }
 0x313   : > { %v1408_v37 = vadd.f32 1.0, %v2743_v0  ;;  %2756 = vpow2.f32 %v2527_v35  ;;  %v2532_v41 = vmul.f32 -1.442695, %v3694_v49  ;;  %v3701_v51 = vadd.f32 %v3636_v30, %v1278_v46  ;;  %v3703_v28 = vpop.permute.xlu1 %1943  ;;  %v3711_v46 = vpop.permute.xlu0 %1875 }
 0x314   : > { %4296 = vst [vmem:[#allocation34_spill] sm:$0xff] %v3703_v28  ;;  %v2745_v27 = vpop.eup %2744  ;;  %v1289_v54 = vadd.f32 %v2631_v6, %v3599_v4  ;;  %v1280_v43 = vpop.f32.mrf.mxu1  ;;  %4297 = vst [vmem:[#allocation35_spill] sm:$0xff] %v3711_v46 }
 0x315   : > { %2758 = vrcp.f32 %v1408_v37  ;;  %v1406_v55 = vadd.f32 1.0, %v2745_v27  ;;  %v2530_v59 = vmul.f32 -1.442695, %v3701_v51  ;;  %v1281_v25 = vadd.f32 %v1280_v43, %v3603_v13 }
 0x316   : > { %v2747_v2 = vpop.eup %2746  ;;  %2760 = vpow2.f32 %v2532_v41  ;;  %v3709_v35 = vadd.f32 %v3636_v30, %v1289_v54  ;;  %v2634_v0 = vpop.f32.mrf.mxu1 }
 0x317   : > { %2762 = vrcp.f32 %v1406_v55  ;;  %v1409_v28 = vadd.f32 1.0, %v2747_v2  ;;  %v3714_v20 = vadd.f32 %v3636_v30, %v1281_v25  ;;  %v1302_v37 = vadd.f32 %v2634_v0, %v3607_v22  ;;  %v3717_v4 = vpop.permute.xlu1 %1947  ;;  %v1880_v22 = vpop.permute.xlu0 %1879 }
 0x318   : > { %4298 = vst [vmem:[#allocation36_spill] sm:$0xff] %v3717_v4  ;;  %v2749_v6 = vpop.eup %2748  ;;  %2764 = vpow2.f32 %v2530_v59  ;;  %v2533_v13 = vmul.f32 -1.442695, %v3709_v35  ;;  %v1293_v41 = vpop.f32.mrf.mxu1 }
 0x319   : > { %2766 = vrcp.f32 %v1409_v28  ;;  %v1407_v54 = vadd.f32 1.0, %v2749_v6  ;;  %v2531_v27 = vmul.f32 -1.442695, %v3714_v20  ;;  %v3722_v43 = vadd.f32 %v3636_v30, %v1302_v37 }
 0x31a   : > { %v2751_v55 = vpop.eup %2750  ;;  %2768 = vpow2.f32 %v2533_v13  ;;  %v1294_v2 = vadd.f32 %v1293_v41, %v3611_v63  ;;  %v2635_v25 = vpop.f32.mrf.mxu1 }
 0x31b   : > { %2770 = vrcp.f32 %v1407_v54  ;;  %v1412_v0 = vadd.f32 1.0, %v2751_v55  ;;  %v2536_v59 = vmul.f32 -1.442695, %v3722_v43  ;;  %v1305_v4 = vadd.f32 %v2635_v25, %v3615_v23  ;;  %v3727_v46 = vpop.permute.xlu1 %1951 }
 0x31c   : > { %4299 = vst [vmem:[#allocation37_spill] sm:$0xff] %v3727_v46  ;;  %v2753_v28 = vpop.eup %2752  ;;  %2772 = vpow2.f32 %v2531_v27  ;;  %v3730_v6 = vadd.f32 %v3636_v30, %v1294_v2  ;;  %v1296_v37 = vpop.f32.mrf.mxu1  ;;  %v1920_v55 = vadd.f32 %v1880_v22, %v3527_v44 }
 0x31d   : > { %2774 = vrcp.f32 %v1412_v0  ;;  %v1410_v13 = vadd.f32 1.0, %v2753_v28  ;;  %v3733_v63 = vadd.f32 %v3636_v30, %v1305_v4  ;;  %v1297_v41 = vadd.f32 %v1296_v37, %v3619_v33 }
 0x31e   : > { %v2755_v54 = vpop.eup %2754  ;;  %2776 = vpow2.f32 %v2536_v59  ;;  %v2534_v23 = vmul.f32 -1.442695, %v3730_v6  ;;  %v2638_v25 = vpop.f32.mrf.mxu1 }
 0x31f   : > { %2778 = vrcp.f32 %v1410_v13  ;;  %v1413_v27 = vadd.f32 1.0, %v2755_v54  ;;  %v2537_v2 = vmul.f32 -1.442695, %v3733_v63  ;;  %v3740_v46 = vadd.f32 %v3636_v30, %v1297_v41  ;;  %v1956_v0 = vpop.permute.xlu1 %1955 }
 0x320   : > { %v2757_v28 = vpop.eup %2756  ;;  %2780 = vpow2.f32 %v2534_v23  ;;  %v1318_v4 = vadd.f32 %v2638_v25, %v3621_v26  ;;  %v3743_v33 = vadd.f32 %v1956_v0, %v1920_v55  ;;  %v1309_v37 = vpop.f32.mrf.mxu1 }
 0x321   : > { %2782 = vrcp.f32 %v1413_v27  ;;  %v1411_v44 = vadd.f32 1.0, %v2757_v28  ;;  %v2535_v22 = vmul.f32 -1.442695, %v3740_v46  ;;  %v1310_v59 = vadd.f32 %v1309_v37, %v3625_v32 }
 0x322   : > { %4300 = vst [vmem:[#allocation38_spill] sm:$0xff] %v3743_v33  ;;  %v2759_v13 = vpop.eup %2758  ;;  %2784 = vpow2.f32 %v2537_v2  ;;  %v3748_v54 = vadd.f32 %v3636_v30, %v1318_v4  ;;  %v2639_v41 = vpop.f32.mrf.mxu1 }
 0x323   : > { %v2761_v17 = vpop.eup %2760  ;;  %2786 = vrcp.f32 %v1411_v44  ;;  %v3751_v23 = vadd.f32 %v3636_v30, %v1310_v59 }
 0x324   : > { %v2763_v26 = vpop.eup %2762  ;;  %v1416_v55 = vadd.f32 1.0, %v2761_v17  ;;  %2788 = vpow2.f32 %v2535_v22  ;;  %v2540_v25 = vmul.f32 -1.442695, %v3748_v54  ;;  %v1312_v27 = vpop.f32.mrf.mxu1 }
 0x325   : > { %v2765_v0 = vpop.eup %2764  ;;  %v2538_v32 = vmul.f32 -1.442695, %v3751_v23  ;;  %v1313_v2 = vadd.f32 %v1312_v27, %v3631_v47  ;;  %v1463_v33 = vmul.f32 %v2763_v26, %v3649_v8  ;;  %v1465_v27 = vmul.f32 %v2759_v13, %v3643_v12 }
 0x326   : > { %v2767_v28 = vpop.eup %2766  ;;  %2790 = vrcp.f32 %v1416_v55  ;;  %v1414_v4 = vadd.f32 1.0, %v2765_v0 }
 0x327   : > { %v2769_v37 = vpop.eup %2768  ;;  %2792 = vpow2.f32 %v2540_v25  ;;  %v3757_v44 = vadd.f32 %v3636_v30, %v1313_v2  ;;  %v1466_v17 = vmul.f32 %v2767_v28, %v3655_v24 }
 0x328   : > { %v2771_v59 = vpop.eup %2770  ;;  %2794 = vrcp.f32 %v1414_v4  ;;  %v1417_v22 = vadd.f32 1.0, %v2769_v37 }
 0x329   : > { %v2773_v41 = vpop.eup %2772  ;;  %v1464_v61 = vmul.f32 %v2771_v59, %v3661_v31  ;;  %2796 = vpow2.f32 %v2538_v32  ;;  %v2539_v47 = vmul.f32 -1.442695, %v3757_v44  ;;  %v1483_v24 = vpack.c.bf16 %v1466_v17, %v1465_v27 }
 0x32a   : > { %v2775_v55 = vpop.eup %2774  ;;  %2798 = vrcp.f32 %v1417_v22  ;;  %v1415_v25 = vadd.f32 1.0, %v2773_v41 }
 0x32b   : > { %v2777_v30 = vpop.eup %2776  ;;  %v1482_v0 = vpack.c.bf16 %v1464_v61, %v1463_v33  ;;  %2800 = vpow2.f32 %v2539_v47  ;;  %v1469_v59 = vmul.f32 %v2775_v55, %v3667_v62 }
 0x32c   : > { %v2779_v2 = vpop.eup %2778  ;;  %2802 = vrcp.f32 %v1415_v25  ;;  %v1420_v32 = vadd.f32 1.0, %v2777_v30 }
 0x32d   : > { %v2781_v28 = vpop.eup %2780  ;;  %2644 = vmatprep.mubr.msk.bf16.mxu1 %vm1026_vm7, %v1482_v0  ;;  %v1467_v61 = vmul.f32 %v2779_v2, %v3673_v21 }
 0x32e   : > { %v2783_v8 = vpop.eup %2782  ;;  %v1418_v26 = vadd.f32 1.0, %v2781_v28  ;;  %2645 = vmatmul.mubr.msk.bf16.vlgmr.msra.gmra.mxu1 %vm1026_vm7, %v1483_v24 }
 0x32f   : > { %v2785_v31 = vpop.eup %2784  ;;  %v1470_v12 = vmul.f32 %v2783_v8, %v3680_v10 }
 0x330   : > { %v2787_v4 = vpop.eup %2786  ;;  %v1421_v13 = vadd.f32 1.0, %v2785_v31  ;;  %2804 = vrcp.f32 %v1418_v26 }
 0x331   : > { %v2789_v37 = vpop.eup %2788  ;;  %v1468_v33 = vmul.f32 %v2787_v4, %v3687_v29  ;;  %v1485_v27 = vpack.c.bf16 %v1470_v12, %v1469_v59 }
 0x332   : > { %2806 = vrcp.f32 %v1421_v13  ;;  %v1419_v17 = vadd.f32 1.0, %v2789_v37 }
 0x333   : > { %v2791_v22 = vpop.eup %2790  ;;  %v1484_v41 = vpack.c.bf16 %v1468_v33, %v1467_v61  ;;  %2808 = vrcp.f32 %v1420_v32 }
 0x334   : > { %v2793_v47 = vpop.eup %2792  ;;  %2810 = vrcp.f32 %v1419_v17  ;;  %v1473_v8 = vmul.f32 %v2791_v22, %v3694_v49 }
 0x335   : > { %v2795_v25 = vpop.eup %2794  ;;  %v1424_v30 = vadd.f32 1.0, %v2793_v47  ;;  %2648 = vmatprep.mubr.msk.bf16.mxu1 %vm1026_vm7, %v1484_v41 }
 0x336   : > { %v2797_v10 = vpop.eup %2796  ;;  %2649 = vmatmul.mubr.msk.bf16.gmra.mxu1 %vm1026_vm7, %v1485_v27  ;;  %v1471_v24 = vmul.f32 %v2795_v25, %v3701_v51 }
 0x337   : > { %v2799_v21 = vpop.eup %2798  ;;  %v1422_v29 = vadd.f32 1.0, %v2797_v10  ;;  %2812 = vrcp.f32 %v1424_v30 }
 0x338   : > { %v2801_v0 = vpop.eup %2800  ;;  %v1474_v55 = vmul.f32 %v2799_v21, %v3709_v35 }
 0x339   : > { %v2803_v62 = vpop.eup %2802  ;;  %2814 = vrcp.f32 %v1422_v29  ;;  %v1423_v2 = vadd.f32 1.0, %v2801_v0 }
 0x33a   : > { %v1472_v28 = vmul.f32 %v2803_v62, %v3714_v20  ;;  %v1487_v31 = vpack.c.bf16 %v1474_v55, %v1473_v8 }
 0x33b   : > { %2816 = vrcp.f32 %v1423_v2 }
 0x33c   : > { %v1486_v26 = vpack.c.bf16 %v1472_v28, %v1471_v24 }
 0x33d   : > { %v2805_v32 = vpop.eup %2804 }
 0x33e   : > { %2652 = vmatprep.mubr.msk.bf16.mxu1 %vm1026_vm7, %v1486_v26  ;;  %v1475_v37 = vmul.f32 %v2805_v32, %v3730_v6 }
 0x33f   : > { %v2807_v4 = vpop.eup %2806  ;;  %2653 = vmatmul.mubr.msk.bf16.gmra.mxu1 %vm1026_vm7, %v1487_v31 }
 0x340   : > { %v2809_v12 = vpop.eup %2808  ;;  %v1478_v35 = vmul.f32 %v2807_v4, %v3733_v63 }
 0x341   : > { %v2811_v13 = vpop.eup %2810  ;;  %v1477_v20 = vmul.f32 %v2809_v12, %v3722_v43 }
 0x342   : > { %v1476_v51 = vmul.f32 %v2811_v13, %v3740_v46  ;;  %v3792_v46 = vld [vmem:[%s4236_s7] ss:$0 sm:$0xff] }
 0x343   : > { %v1489_v33 = vpack.c.bf16 %v1478_v35, %v1477_v20 }
 0x344   : > { %v1488_v49 = vpack.c.bf16 %v1476_v51, %v1475_v37  ;;  %v2813_v61 = vpop.eup %2812 }
 0x345   : > { %v1481_v22 = vmul.f32 %v2813_v61, %v3748_v54 }
 0x346   : > { %v2815_v59 = vpop.eup %2814  ;;  %2656 = vmatprep.mubr.msk.bf16.mxu1 %vm1026_vm7, %v1488_v49 }
 0x347   : > { %2657 = vmatmul.mubr.msk.bf16.gmra.mxu1 %vm1026_vm7, %v1489_v33  ;;  %v1479_v41 = vmul.f32 %v2815_v59, %v3751_v23  ;;  %v1491_v47 = vpack.c.bf16 %v1481_v22, %v1481_v22  ;;  %v3883_v59 = vpop.permute.xlu0 %1883 }
 0x348   : > { %v2817_v17 = vpop.eup %2816  ;;  %4301 = vst [vmem:[#allocation39_spill] sm:$0xff] %v3883_v59  ;;  %v1907_v59 = vadd.f32 %v3597_v1, %v3440_v53  ;;  %v1905_v1 = vadd.f32 %v3593_v56, %v3422_v57 }
 0x349   : > { %v1480_v63 = vmul.f32 %v2817_v17, %v3757_v44 }
 0x34b   : > { %v1490_v6 = vpack.c.bf16 %v1480_v63, %v1479_v41  ;;  %v3893_v17 = vpop.permute.xlu0 %1925 }
 0x34d   : > { %2660 = vmatprep.mubr.msk.bf16.mxu1 %vm1026_vm7, %v1490_v6 }
 0x34f   : > { %2661 = vmatmul.mubr.msk.bf16.gmra.mxu1 %vm1026_vm7, %v1491_v47  ;;  %v1930_v41 = vpop.permute.xlu0 %1929 }
 0x353   : > { %v3913_v6 = vpop.permute.xlu0 %1933 }
 0x3ee   : > { %v2646_v43 = vpop.f32.mrf.mxu1 }
 0x3ef   : > { %v3795_v27 = vadd.f32 %v2646_v43, %v3792_v46 }
 0x3f0   : > { %v1579_v54 = vpop.f32.mrf.mxu1 }
 0x3f1   : > { %2098 = vrot.lane.b32.xlu1 %v3795_v27, %s2828_s16  ;;  %2022 = vrot.lane.b32.xlu0 %v3795_v27, %s2827_s15  ;;  %v3802_v44 = vadd.f32 %v3792_v46, %v1579_v54  ;;  %v3925_v54 = vpop.permute.xlu0 %1937 }
 0x3f2   : > { %v2647_v23 = vpop.f32.mrf.mxu1 }
 0x3f3   : > { %v3809_v10 = vadd.f32 %v2647_v23, %v3792_v46 }
 0x3f4   : > { %v1582_v25 = vpop.f32.mrf.mxu1 }
 0x3f5   : > { %2174 = vrot.lane.b32.xlu0 %v3795_v27, %s2829_s21  ;;  %2094 = vrot.lane.b32.xlu1 %v3802_v44, %s2828_s16  ;;  %v3820_v62 = vadd.f32 %v3792_v46, %v1582_v25  ;;  %v3935_v23 = vpop.permute.xlu0 %1941 }
 0x3f6   : > { %v2650_v30 = vpop.f32.mrf.mxu1 }
 0x3f7   : > { %v3831_v8 = vadd.f32 %v2650_v30, %v3792_v46 }
 0x3f8   : > { %v1595_v21 = vpop.f32.mrf.mxu1 }
 0x3f9   : > { %2024 = vrot.lane.b32.xlu1 %v3809_v10, %s2827_s15  ;;  %2018 = vrot.lane.b32.xlu0 %v3802_v44, %s2827_s15  ;;  %v3838_v32 = vadd.f32 %v3792_v46, %v1595_v21  ;;  %v3944_v30 = vpop.permute.xlu0 %1945 }
 0x3fa   : > { %v2651_v29 = vpop.f32.mrf.mxu1 }
 0x3fb   : > { %v3845_v13 = vadd.f32 %v2651_v29, %v3792_v46 }
 0x3fc   : > { %v1598_v0 = vpop.f32.mrf.mxu1 }
 0x3fd   : > { %2176 = vrot.lane.b32.xlu1 %v3809_v10, %s2829_s21  ;;  %2170 = vrot.lane.b32.xlu0 %v3802_v44, %s2829_s21  ;;  %v3856_v20 = vadd.f32 %v3792_v46, %v1598_v0 }
 0x3ff   : > { %v2654_v55 = vpop.f32.mrf.mxu1 }
 0x400   : > { %v3867_v49 = vadd.f32 %v2654_v55, %v3792_v46  ;;  %v3960_v55 = vpop.permute.xlu0 %1949 }
 0x401   : > { %v1611_v2 = vpop.f32.mrf.mxu1  ;;  %2020 = vrot.lane.b32.xlu1 %v3820_v62, %s2827_s15  ;;  %2100 = vrot.lane.b32.xlu0 %v3809_v10, %s2828_s16 }
 0x402   : > { %v3874_v61 = vadd.f32 %v3792_v46, %v1611_v2 }
 0x403   : > { %v2655_v24 = vpop.f32.mrf.mxu1 }
 0x404   : > { %v3881_v33 = vadd.f32 %v2655_v24, %v3792_v46  ;;  %v3969_v24 = vpop.permute.xlu0 %1953 }
 0x405   : > { %v1614_v28 = vpop.f32.mrf.mxu1  ;;  %2172 = vrot.lane.b32.xlu1 %v3820_v62, %s2829_s21  ;;  %2096 = vrot.lane.b32.xlu0 %v3820_v62, %s2828_s16 }
 0x406   : > { %v3896_v22 = vadd.f32 %v3792_v46, %v1614_v28 }
 0x407   : > { %v2658_v26 = vpop.f32.mrf.mxu1 }
 0x408   : > { %v3907_v63 = vadd.f32 %v2658_v26, %v3792_v46  ;;  %v3981_v28 = vpop.permute.xlu0 %1957  ;;  %v1906_v26 = vadd.f32 %v3638_v14, %v3433_v60 }
 0x409   : > { %v1627_v31 = vpop.f32.mrf.mxu1  ;;  %2106 = vrot.lane.b32.xlu1 %v3831_v8, %s2828_s16  ;;  %2030 = vrot.lane.b32.xlu0 %v3831_v8, %s2827_s15  ;;  %4303 = vst [vmem:[#allocation41_spill] sm:$0xff] %v3981_v28 }
 0x40a   : > { %v3916_v47 = vadd.f32 %v3792_v46, %v1627_v31  ;;  %v1982_v31 = vadd.f32 %v3651_v3, %v1906_v26  ;;  %v1983_v26 = vadd.f32 %v1930_v41, %v1907_v59 }
 0x40b   : > { %v2659_v4 = vpop.f32.mrf.mxu1 }
 0x40c   : > { %v3923_v43 = vadd.f32 %v2659_v4, %v3792_v46 }
 0x40d   : > { %v1630_v12 = vpop.f32.mrf.mxu1  ;;  %2102 = vrot.lane.b32.xlu1 %v3838_v32, %s2828_s16  ;;  %2182 = vrot.lane.b32.xlu0 %v3831_v8, %s2829_s21 }
 0x40e   : > { %v3938_v25 = vadd.f32 %v3792_v46, %v1630_v12 }
 0x40f   : > { %v2662_v35 = vpop.f32.mrf.mxu1 }
 0x410   : > { %v3951_v21 = vadd.f32 %v2662_v35, %v3792_v46 }
 0x411   : > { %v1643_v37 = vpop.f32.mrf.mxu1  ;;  %2032 = vrot.lane.b32.xlu1 %v3845_v13, %s2827_s15  ;;  %2026 = vrot.lane.b32.xlu0 %v3838_v32, %s2827_s15 }
 0x412   : > { %v3954_v29 = vadd.f32 %v3792_v46, %v1643_v37 }
 0x413   : > { %v2663_v51 = vpop.f32.mrf.mxu1 }
 0x415   : > { %2184 = vrot.lane.b32.xlu1 %v3845_v13, %s2829_s21  ;;  %2178 = vrot.lane.b32.xlu0 %v3838_v32, %s2829_s21  ;;  %v1646_v0 = vpop.f32.mrf.mxu1 }
 0x416   : > { %v3963_v2 = vadd.f32 %v3792_v46, %v1646_v0  ;;  %v3979_v46 = vpop.permute.xlu1 %1959 }
 0x417   : > { %4302 = vst [vmem:[#allocation40_spill] sm:$0xff] %v3979_v46  ;;  %v1904_v46 = vadd.f32 %v3627_v39, %v3415_v38 }
 0x419   : > { %2028 = vrot.lane.b32.xlu1 %v3856_v20, %s2827_s15  ;;  %2108 = vrot.lane.b32.xlu0 %v3845_v13, %s2828_s16  ;;  %v1980_v3 = vadd.f32 %v3640_v15, %v1904_v46 }
 0x41d   : > { %2180 = vrot.lane.b32.xlu1 %v3856_v20, %s2829_s21  ;;  %2104 = vrot.lane.b32.xlu0 %v3856_v20, %s2828_s16 }
 0x421   : > { %2114 = vrot.lane.b32.xlu1 %v3867_v49, %s2828_s16  ;;  %2038 = vrot.lane.b32.xlu0 %v3867_v49, %s2827_s15 }
 0x425   : > { %2110 = vrot.lane.b32.xlu1 %v3874_v61, %s2828_s16  ;;  %2190 = vrot.lane.b32.xlu0 %v3867_v49, %s2829_s21 }
 0x429   : > { %2040 = vrot.lane.b32.xlu1 %v3881_v33, %s2827_s15  ;;  %2034 = vrot.lane.b32.xlu0 %v3874_v61, %s2827_s15 }
 0x42d   : > { %2192 = vrot.lane.b32.xlu1 %v3881_v33, %s2829_s21  ;;  %2186 = vrot.lane.b32.xlu0 %v3874_v61, %s2829_s21 }
 0x431   : > { %2036 = vrot.lane.b32.xlu1 %v3896_v22, %s2827_s15  ;;  %2116 = vrot.lane.b32.xlu0 %v3881_v33, %s2828_s16 }
 0x435   : > { %2188 = vrot.lane.b32.xlu1 %v3896_v22, %s2829_s21  ;;  %2112 = vrot.lane.b32.xlu0 %v3896_v22, %s2828_s16 }
 0x439   : > { %2122 = vrot.lane.b32.xlu1 %v3907_v63, %s2828_s16  ;;  %2046 = vrot.lane.b32.xlu0 %v3907_v63, %s2827_s15 }
 0x43d   : > { %2118 = vrot.lane.b32.xlu1 %v3916_v47, %s2828_s16  ;;  %2198 = vrot.lane.b32.xlu0 %v3907_v63, %s2829_s21 }
 0x441   : > { %2048 = vrot.lane.b32.xlu1 %v3923_v43, %s2827_s15  ;;  %2042 = vrot.lane.b32.xlu0 %v3916_v47, %s2827_s15 }
 0x445   : > { %2200 = vrot.lane.b32.xlu1 %v3923_v43, %s2829_s21  ;;  %2194 = vrot.lane.b32.xlu0 %v3916_v47, %s2829_s21 }
 0x449   : > { %2044 = vrot.lane.b32.xlu1 %v3938_v25, %s2827_s15  ;;  %2124 = vrot.lane.b32.xlu0 %v3923_v43, %s2828_s16 }
 0x44d   : > { %2196 = vrot.lane.b32.xlu1 %v3938_v25, %s2829_s21  ;;  %2120 = vrot.lane.b32.xlu0 %v3938_v25, %s2828_s16 }
 0x451   : > { %2126 = vrot.lane.b32.xlu1 %v3954_v29, %s2828_s16  ;;  %2206 = vrot.lane.b32.xlu0 %v3951_v21, %s2829_s21 }
 0x455   : > { %2204 = vrot.lane.b32.xlu1 %v3963_v2, %s2829_s21  ;;  %2202 = vrot.lane.b32.xlu0 %v3954_v29, %s2829_s21 }
 0x459   : > { %2130 = vrot.lane.b32.xlu1 %v3951_v21, %s2828_s16  ;;  %2128 = vrot.lane.b32.xlu0 %v3963_v2, %s2828_s16 }
 0x45d   : > { %2052 = vrot.lane.b32.xlu1 %v3963_v2, %s2827_s15  ;;  %2050 = vrot.lane.b32.xlu0 %v3954_v29, %s2827_s15 }
 0x461   : > { %2054 = vrot.lane.b32.xlu0 %v3951_v21, %s2827_s15 }
 0x463   : > { %v2099_v4 = vpop.permute.xlu1 %2098  ;;  %v2023_v12 = vpop.permute.xlu0 %2022 }
 0x464   : > { %v2077_v35 = vmul.f32 %v2023_v12, %v1982_v31 }
 0x466   : > { %v3988_v37 = vadd.f32 %v2099_v4, %v2077_v35 }
 0x467   : > { %v2175_v51 = vpop.permute.xlu0 %2174  ;;  %v2095_v0 = vpop.permute.xlu1 %2094 }
 0x468   : > { %4304 = vst [vmem:[#allocation42_spill] sm:$0xff] %v3988_v37  ;;  %v2229_v60 = vsel %vm1026_vm7, %v3795_v27, %v2175_v51 }
 0x469   : > { %v2249_v14 = vsel %vm2246_vm8, %v2229_v60, %v2099_v4 }
 0x46a   : > { %v2268_v31 = vmul.f32 %v2249_v14, %v2984_v48  ;;  %v1981_v48 = vadd.f32 %v3893_v17, %v1905_v1 }
 0x46b   : > { %v2025_v12 = vpop.permute.xlu1 %2024  ;;  %v2019_v35 = vpop.permute.xlu0 %2018 }
 0x46c   : > { %v2078_v37 = vmul.f32 %v2025_v12, %v1983_v26  ;;  %v2075_v28 = vmul.f32 %v2019_v35, %v1980_v3  ;;  %2308 = vrot.lane.b32.xlu1 %v2268_v31, %s2829_s21 }
 0x46e   : > { %v4000_v38 = vadd.f32 %v2095_v0, %v2075_v28 }
 0x46f   : > { %v2177_v39 = vpop.permute.xlu1 %2176  ;;  %v2171_v53 = vpop.permute.xlu0 %2170 }
 0x470   : > { %v2227_v27 = vsel %vm1026_vm7, %v3802_v44, %v2171_v53  ;;  %v2230_v41 = vsel %vm1026_vm7, %v3809_v10, %v2177_v39 }
 0x471   : > { %v2247_v15 = vsel %vm2246_vm8, %v2227_v27, %v2095_v0 }
 0x472   : > { %v2266_v59 = vmul.f32 %v2247_v15, %v2966_v42  ;;  %v1910_v42 = vadd.f32 %v3657_v9, %v3466_v5  ;;  %v1908_v5 = vadd.f32 %v3645_v18, %v3451_v16 }
 0x473   : > { %v2021_v46 = vpop.permute.xlu1 %2020  ;;  %v2101_v28 = vpop.permute.xlu0 %2100 }
 0x474   : > { %v2076_v4 = vmul.f32 %v2021_v46, %v1981_v48  ;;  %v4011_v51 = vadd.f32 %v2101_v28, %v2078_v37  ;;  %v2250_v60 = vsel %vm2246_vm8, %v2230_v41, %v2101_v28  ;;  %2304 = vrot.lane.b32.xlu1 %v2266_v59, %s2829_s21  ;;  %v1986_v0 = vadd.f32 %v3676_v40, %v1910_v42 }
 0x475   : > { %v2269_v57 = vmul.f32 %v2250_v60, %v2990_v50  ;;  %v1984_v35 = vadd.f32 %v3663_v34, %v1908_v5 }
 0x477   : > { %v2173_v56 = vpop.permute.xlu1 %2172  ;;  %2310 = vrot.lane.b32.xlu0 %v2269_v57, %s2829_s21  ;;  %v2097_v44 = vpop.permute.xlu0 %2096  ;;  %v4306_v57 = vld [vmem:[#allocation17_spill] sm:$0xff] }
 0x478   : > { %v2228_v10 = vsel %vm1026_vm7, %v3820_v62, %v2173_v56  ;;  %v4021_v17 = vadd.f32 %v2097_v44, %v2076_v4  ;;  %v1911_v62 = vadd.f32 %v3605_v19, %v3473_v11  ;;  %v1909_v19 = vadd.f32 %v3601_v7, %v3458_v36  ;;  %v4305_v36 = vld [vmem:[#allocation3_spill] sm:$0xff] }
 0x479   : > { %v2248_v37 = vsel %vm2246_vm8, %v2228_v10, %v2097_v44  ;;  %v4308_v10 = vld [vmem:[#allocation34_spill] sm:$0xff] }
 0x47a   : > { %v2267_v14 = vmul.f32 %v2248_v37, %v2974_v45  ;;  %v1987_v39 = vadd.f32 %v3925_v54, %v1911_v62  ;;  %v4310_v62 = vld [vmem:[#allocation15_spill] sm:$0xff] }
 0x47b   : > { %v2107_v3 = vpop.permute.xlu1 %2106  ;;  %v2031_v50 = vpop.permute.xlu0 %2030 }
 0x47c   : > { %v2081_v26 = vmul.f32 %v2031_v50, %v1986_v0  ;;  %2306 = vrot.lane.b32.xlu0 %v2267_v14, %s2829_s21  ;;  %v4309_v0 = vld [vmem:[#allocation2_spill] sm:$0xff] }
 0x47e   : > { %v4027_v31 = vadd.f32 %v2107_v3, %v2081_v26 }
 0x47f   : > { %v2103_v12 = vpop.permute.xlu1 %2102  ;;  %v2183_v9 = vpop.permute.xlu0 %2182 }
 0x480   : > { %v2233_v40 = vsel %vm1026_vm7, %v3831_v8, %v2183_v9 }
 0x481   : > { %v2253_v45 = vsel %vm2246_vm8, %v2233_v40, %v2107_v3  ;;  %v4311_v40 = vld [vmem:[#allocation30_spill] sm:$0xff] }
 0x482   : > { %v2272_v53 = vmul.f32 %v2253_v45, %v3007_v58  ;;  %v1985_v58 = vadd.f32 %v3913_v6, %v1909_v19  ;;  %v4312_v45 = vld [vmem:[#allocation18_spill] sm:$0xff] }
 0x483   : > { %v2033_v1 = vpop.permute.xlu1 %2032  ;;  %v2027_v27 = vpop.permute.xlu0 %2026 }
 0x484   : > { %v2082_v15 = vmul.f32 %v2033_v1, %v1987_v39  ;;  %v2079_v48 = vmul.f32 %v2027_v27, %v1984_v35  ;;  %2316 = vrot.lane.b32.xlu1 %v2272_v53, %s2829_s21  ;;  %v4313_v35 = vld [vmem:[#allocation26_spill] sm:$0xff]  ;;  %v4314_v27 = vld [vmem:[#allocation32_spill] sm:$0xff] }
 0x485   : > { %v1915_v39 = vadd.f32 %v4313_v35, %v4312_v45 }
 0x486   : > { %v4040_v18 = vadd.f32 %v2103_v12, %v2079_v48 }
 0x487   : > { %v2185_v16 = vpop.permute.xlu1 %2184  ;;  %v2179_v11 = vpop.permute.xlu0 %2178  ;;  %v1991_v48 = vadd.f32 %v3944_v30, %v1915_v39 }
 0x488   : > { %v2231_v34 = vsel %vm1026_vm7, %v3838_v32, %v2179_v11  ;;  %v2234_v59 = vsel %vm1026_vm7, %v3845_v13, %v2185_v16  ;;  %v4315_v16 = vld [vmem:[#allocation6_spill] sm:$0xff] }
 0x489   : > { %v2251_v8 = vsel %vm2246_vm8, %v2231_v34, %v2103_v12 }
 0x48a   : > { %v2270_v54 = vmul.f32 %v2251_v8, %v2994_v52  ;;  %v4307_v52 = vld [vmem:[#allocation31_spill] sm:$0xff] }
 0x48b   : > { %v2029_v41 = vpop.permute.xlu1 %2028  ;;  %v2109_v46 = vpop.permute.xlu0 %2108  ;;  %v1914_v56 = vadd.f32 %v4307_v52, %v4306_v57 }
 0x48c   : > { %v2080_v28 = vmul.f32 %v2029_v41, %v1985_v58  ;;  %v4051_v4 = vadd.f32 %v2109_v46, %v2082_v15  ;;  %v2254_v60 = vsel %vm2246_vm8, %v2234_v59, %v2109_v46  ;;  %2312 = vrot.lane.b32.xlu1 %v2270_v54, %s2829_s21  ;;  %v4316_v46 = vld [vmem:[#allocation16_spill] sm:$0xff] }
 0x48d   : > { %v2273_v7 = vmul.f32 %v2254_v60, %v4305_v36  ;;  %v1990_v37 = vadd.f32 %v4308_v10, %v1914_v56  ;;  %v4319_v10 = vld [vmem:[#allocation7_spill] sm:$0xff] }
 0x48f   : > { %v2181_v32 = vpop.permute.xlu1 %2180  ;;  %2318 = vrot.lane.b32.xlu0 %v2273_v7, %s2829_s21  ;;  %v2105_v6 = vpop.permute.xlu0 %2104  ;;  %v4318_v7 = vld [vmem:[#allocation4_spill] sm:$0xff] }
 0x490   : > { %v2232_v13 = vsel %vm1026_vm7, %v3856_v20, %v2181_v32  ;;  %v4061_v44 = vadd.f32 %v2105_v6, %v2080_v28  ;;  %v1912_v20 = vadd.f32 %v4311_v40, %v4310_v62  ;;  %v4323_v62 = vld [vmem:[#allocation5_spill] sm:$0xff] }
 0x491   : > { %v2252_v42 = vsel %vm2246_vm8, %v2232_v13, %v2105_v6 }
 0x492   : > { %v2271_v14 = vmul.f32 %v2252_v42, %v4309_v0  ;;  %v1988_v15 = vadd.f32 %v4314_v27, %v1912_v20  ;;  %v4320_v0 = vld [vmem:[#allocation21_spill] sm:$0xff]  ;;  %v4324_v27 = vld [vmem:[#allocation19_spill] sm:$0xff] }
 0x493   : > { %v2115_v3 = vpop.permute.xlu1 %2114  ;;  %v2039_v50 = vpop.permute.xlu0 %2038 }
 0x494   : > { %v2085_v26 = vmul.f32 %v2039_v50, %v1990_v37  ;;  %2314 = vrot.lane.b32.xlu0 %v2271_v14, %s2829_s21  ;;  %v4321_v14 = vld [vmem:[#allocation35_spill] sm:$0xff] }
 0x496   : > { %v4067_v12 = vadd.f32 %v2115_v3, %v2085_v26 }
 0x497   : > { %v2111_v9 = vpop.permute.xlu1 %2110  ;;  %v2191_v5 = vpop.permute.xlu0 %2190 }
 0x498   : > { %v2237_v53 = vsel %vm1026_vm7, %v3867_v49, %v2191_v5  ;;  %v4317_v49 = vld [vmem:[#allocation25_spill] sm:$0xff] }
 0x499   : > { %v2257_v1 = vsel %vm2246_vm8, %v2237_v53, %v2115_v3  ;;  %v1913_v28 = vadd.f32 %v4317_v49, %v4316_v46  ;;  %v1918_v3 = vadd.f32 %v4321_v14, %v4320_v0 }
 0x49a   : > { %v2276_v11 = vmul.f32 %v2257_v1, %v4315_v16  ;;  %v4327_v16 = vld [vmem:[#allocation28_spill] sm:$0xff] }
 0x49b   : > { %v2041_v19 = vpop.permute.xlu1 %2040  ;;  %v2035_v34 = vpop.permute.xlu0 %2034  ;;  %v1989_v36 = vadd.f32 %v3935_v23, %v1913_v28 }
 0x49c   : > { %v2086_v8 = vmul.f32 %v2041_v19, %v1991_v48  ;;  %v2083_v58 = vmul.f32 %v2035_v34, %v1988_v15  ;;  %2324 = vrot.lane.b32.xlu1 %v2276_v11, %s2829_s21  ;;  %v4325_v15 = vld [vmem:[#allocation33_spill] sm:$0xff]  ;;  %v4326_v48 = vld [vmem:[#allocation22_spill] sm:$0xff] }
 0x49d   : > { %v1919_v11 = vadd.f32 %v4327_v16, %v4326_v48 }
 0x49e   : > { %v4080_v54 = vadd.f32 %v2111_v9, %v2083_v58 }
 0x49f   : > { %v2193_v59 = vpop.permute.xlu1 %2192  ;;  %v2187_v41 = vpop.permute.xlu0 %2186 }
 0x4a0   : > { %v2235_v60 = vsel %vm1026_vm7, %v3874_v61, %v2187_v41  ;;  %v2238_v6 = vsel %vm1026_vm7, %v3881_v33, %v2193_v59  ;;  %v1995_v59 = vadd.f32 %v3969_v24, %v1919_v11  ;;  %v4329_v41 = vld [vmem:[#allocation10_spill] sm:$0xff] }
 0x4a1   : > { %v2255_v30 = vsel %vm2246_vm8, %v2235_v60, %v2111_v9  ;;  %v4322_v9 = vld [vmem:[#allocation37_spill] sm:$0xff] }
 0x4a2   : > { %v2274_v32 = vmul.f32 %v2255_v30, %v4318_v7  ;;  %v1994_v5 = vadd.f32 %v4322_v9, %v1918_v3 }
 0x4a3   : > { %v2037_v57 = vpop.permute.xlu1 %2036  ;;  %v2117_v52 = vpop.permute.xlu0 %2116 }
 0x4a4   : > { %v2084_v56 = vmul.f32 %v2037_v57, %v1989_v36  ;;  %v4091_v13 = vadd.f32 %v2117_v52, %v2086_v8  ;;  %v2258_v42 = vsel %vm2246_vm8, %v2238_v6, %v2117_v52  ;;  %2320 = vrot.lane.b32.xlu1 %v2274_v32, %s2829_s21  ;;  %v4328_v8 = vld [vmem:[#allocation36_spill] sm:$0xff] }
 0x4a5   : > { %v2277_v61 = vmul.f32 %v2258_v42, %v4319_v10  ;;  %v4330_v6 = vld [vmem:[#allocation20_spill] sm:$0xff] }
 0x4a6   : > { %v4332_v42 = vld [vmem:[#allocation8_spill] sm:$0xff] }
 0x4a7   : > { %v2189_v37 = vpop.permute.xlu1 %2188  ;;  %2326 = vrot.lane.b32.xlu0 %v2277_v61, %s2829_s21  ;;  %v2113_v23 = vpop.permute.xlu0 %2112 }
 0x4a8   : > { %v2236_v33 = vsel %vm1026_vm7, %v3896_v22, %v2189_v37  ;;  %v4101_v50 = vadd.f32 %v2113_v23, %v2084_v56  ;;  %v1916_v22 = vadd.f32 %v4325_v15, %v4324_v27  ;;  %v4335_v15 = vld [vmem:[#allocation12_spill] sm:$0xff] }
 0x4a9   : > { %v2256_v26 = vsel %vm2246_vm8, %v2236_v33, %v2113_v23  ;;  %v4333_v33 = vld [vmem:[#allocation11_spill] sm:$0xff] }
 0x4aa   : > { %v2275_v40 = vmul.f32 %v2256_v26, %v4323_v62  ;;  %v1992_v58 = vadd.f32 %v4328_v8, %v1916_v22  ;;  %v4334_v62 = vld [vmem:[#allocation9_spill] sm:$0xff] }
 0x4ab   : > { %v2123_v20 = vpop.permute.xlu1 %2122  ;;  %v2047_v45 = vpop.permute.xlu0 %2046 }
 0x4ac   : > { %v2089_v35 = vmul.f32 %v2047_v45, %v1994_v5  ;;  %2322 = vrot.lane.b32.xlu0 %v2275_v40, %s2829_s21 }
 0x4ae   : > { %v4107_v39 = vadd.f32 %v2123_v20, %v2089_v35 }
 0x4af   : > { %v2119_v53 = vpop.permute.xlu1 %2118  ;;  %v2199_v1 = vpop.permute.xlu0 %2198 }
 0x4b0   : > { %v2241_v19 = vsel %vm1026_vm7, %v3907_v63, %v2199_v1  ;;  %v4331_v63 = vld [vmem:[#allocation27_spill] sm:$0xff] }
 0x4b1   : > { %v2261_v34 = vsel %vm2246_vm8, %v2241_v19, %v2123_v20  ;;  %v1917_v57 = vadd.f32 %v4331_v63, %v4330_v6  ;;  %v4336_v19 = vld [vmem:[#allocation23_spill] sm:$0xff]  ;;  %v4343_v63 = vld [vmem:[#allocation38_spill] sm:$0xff] }
 0x4b2   : > { %v2280_v46 = vmul.f32 %v2261_v34, %v4329_v41  ;;  %v4337_v34 = vld [vmem:[#allocation29_spill] sm:$0xff] }
 0x4b3   : > { %v2049_v49 = vpop.permute.xlu1 %2048  ;;  %v2043_v28 = vpop.permute.xlu0 %2042  ;;  %v1993_v56 = vadd.f32 %v3960_v55, %v1917_v57  ;;  %v1921_v8 = vadd.f32 %v4337_v34, %v4336_v19 }
 0x4b4   : > { %v2090_v60 = vmul.f32 %v2049_v49, %v1995_v59  ;;  %v2087_v30 = vmul.f32 %v2043_v28, %v1992_v58  ;;  %2332 = vrot.lane.b32.xlu1 %v2280_v46, %s2829_s21  ;;  %v4339_v46 = vld [vmem:[#allocation13_spill] sm:$0xff] }
 0x4b6   : > { %v4120_v36 = vadd.f32 %v2119_v53, %v2087_v30  ;;  %v4341_v30 = vld [vmem:[#allocation24_spill] sm:$0xff] }
 0x4b7   : > { %v2201_v7 = vpop.permute.xlu1 %2200  ;;  %v2195_v32 = vpop.permute.xlu0 %2194 }
 0x4b8   : > { %v2239_v52 = vsel %vm1026_vm7, %v3916_v47, %v2195_v32  ;;  %v2242_v61 = vsel %vm1026_vm7, %v3923_v43, %v2201_v7  ;;  %v4342_v7 = vld [vmem:[#allocation39_spill] sm:$0xff] }
 0x4b9   : > { %v2259_v24 = vsel %vm2246_vm8, %v2239_v52, %v2119_v53  ;;  %v1922_v32 = vadd.f32 %v4342_v7, %v4341_v30  ;;  %v4344_v52 = vld [vmem:[#allocation40_spill] sm:$0xff] }
 0x4ba   : > { %v2278_v10 = vmul.f32 %v2259_v24, %v4332_v42 }
 0x4bb   : > { %v2045_v37 = vpop.permute.xlu1 %2044  ;;  %v2125_v23 = vpop.permute.xlu0 %2124  ;;  %v1998_v24 = vadd.f32 %v4344_v52, %v1922_v32 }
 0x4bc   : > { %v2088_v0 = vmul.f32 %v2045_v37, %v1993_v56  ;;  %v4131_v14 = vadd.f32 %v2125_v23, %v2090_v60  ;;  %v2262_v3 = vsel %vm2246_vm8, %v2242_v61, %v2125_v23  ;;  %2328 = vrot.lane.b32.xlu1 %v2278_v10, %s2829_s21 }
 0x4bd   : > { %v2281_v47 = vmul.f32 %v2262_v3, %v4333_v33 }
 0x4bf   : > { %v2197_v26 = vpop.permute.xlu1 %2196  ;;  %2334 = vrot.lane.b32.xlu0 %v2281_v47, %s2829_s21  ;;  %v2121_v55 = vpop.permute.xlu0 %2120 }
 0x4c0   : > { %v2240_v9 = vsel %vm1026_vm7, %v3938_v25, %v2197_v26  ;;  %v4139_v5 = vadd.f32 %v2121_v55, %v2088_v0  ;;  %v4345_v0 = vld [vmem:[#allocation42_spill] sm:$0xff] }
 0x4c1   : > { %v2260_v43 = vsel %vm2246_vm8, %v2240_v9, %v2121_v55 }
 0x4c2   : > { %v2279_v40 = vmul.f32 %v2260_v43, %v4334_v62 }
 0x4c3   : > { %v2127_v20 = vpop.permute.xlu1 %2126  ;;  %v2207_v45 = vpop.permute.xlu0 %2206 }
 0x4c4   : > { %2330 = vrot.lane.b32.xlu0 %v2279_v40, %s2829_s21  ;;  %v2245_v25 = vsel %vm1026_vm7, %v3951_v21, %v2207_v45  ;;  %v4340_v21 = vld [vmem:[#allocation41_spill] sm:$0xff] }
 0x4c5   : > { %v1997_v28 = vadd.f32 %v4340_v21, %v1921_v8 }
 0x4c7   : > { %v2205_v35 = vpop.permute.xlu1 %2204  ;;  %v2203_v53 = vpop.permute.xlu0 %2202 }
 0x4c8   : > { %v2243_v1 = vsel %vm1026_vm7, %v3954_v29, %v2203_v53  ;;  %v2244_v48 = vsel %vm1026_vm7, %v3963_v2, %v2205_v35  ;;  %v4338_v29 = vld [vmem:[#allocation14_spill] sm:$0xff] }
 0x4c9   : > { %v2263_v27 = vsel %vm2246_vm8, %v2243_v1, %v2127_v20 }
 0x4ca   : > { %v2282_v22 = vmul.f32 %v2263_v27, %v4335_v15 }
 0x4cb   : > { %v2131_v16 = vpop.permute.xlu1 %2130  ;;  %v2129_v11 = vpop.permute.xlu0 %2128 }
 0x4cc   : > { %v2265_v58 = vsel %vm2246_vm8, %v2245_v25, %v2131_v16  ;;  %v2264_v59 = vsel %vm2246_vm8, %v2244_v48, %v2129_v11  ;;  %2336 = vrot.lane.b32.xlu1 %v2282_v22, %s2829_s21 }
 0x4cd   : > { %v2284_v41 = vmul.f32 %v2265_v58, %v4338_v29  ;;  %v2283_v49 = vmul.f32 %v2264_v59, %v4339_v46 }
 0x4cf   : > { %v2053_v60 = vpop.permute.xlu1 %2052  ;;  %2338 = vrot.lane.b32.xlu0 %v2283_v49, %s2829_s21  ;;  %v2051_v2 = vpop.permute.xlu0 %2050 }
 0x4d0   : > { %v2092_v6 = vmul.f32 %v2053_v60, %v1997_v28  ;;  %v2091_v57 = vmul.f32 %v2051_v2, %v4343_v63  ;;  %2340 = vrot.lane.b32.xlu1 %v2284_v41, %s2829_s21 }
 0x4d2   : > { %v2168_v56 = vadd.f32 %v2129_v11, %v2092_v6  ;;  %v2167_v42 = vadd.f32 %v2127_v20, %v2091_v57 }
 0x4d3   : > { %v2055_v10 = vpop.permute.xlu0 %2054 }
 0x4d4   : > { %v2093_v61 = vmul.f32 %v2055_v10, %v1998_v24 }
 0x4d6   : > { %v2169_v37 = vadd.f32 %v2131_v16, %v2093_v61 }
 0x4de   : > { %v2309_v23 = vpop.permute.xlu1 %2308 }
 0x4df   : > { %v2363_v3 = vsel %vm1026_vm7, %v4345_v0, %v2309_v23 }
 0x4e0   : > { %2382 = vst [vmem:[%s4170_s19 + $0x10] sm:$0xff] %v2363_v3 }
 0x4e6   : > { %v2305_v33 = vpop.permute.xlu1 %2304 }
 0x4e7   : > { %v2361_v47 = vsel %vm1026_vm7, %v4000_v38, %v2305_v33 }
 0x4e8   : > { %2380 = vst [vmem:[%s4170_s19] sm:$0xff] %v2361_v47 }
 0x4e9   : > { %v2311_v26 = vpop.permute.xlu0 %2310 }
 0x4ea   : > { %v2364_v55 = vsel %vm1026_vm7, %v4011_v51, %v2311_v26 }
 0x4eb   : > { %2383 = vst [vmem:[%s4170_s19 + $0x18] sm:$0xff] %v2364_v55 }
 0x4ee   : > { %v2307_v9 = vpop.permute.xlu0 %2306 }
 0x4ef   : > { %v2362_v43 = vsel %vm1026_vm7, %v4021_v17, %v2307_v9 }
 0x4f0   : > { %2381 = vst [vmem:[%s4170_s19 + $0x8] sm:$0xff] %v2362_v43 }
 0x4f6   : > { %v2317_v62 = vpop.permute.xlu1 %2316 }
 0x4f7   : > { %v2367_v40 = vsel %vm1026_vm7, %v4027_v31, %v2317_v62 }
 0x4f8   : > { %2386 = vst [vmem:[%s4170_s19 + $0x30] sm:$0xff] %v2367_v40 }
 0x4fe   : > { %v2313_v38 = vpop.permute.xlu1 %2312 }
 0x4ff   : > { %v2365_v20 = vsel %vm1026_vm7, %v4040_v18, %v2313_v38 }
 0x500   : > { %2384 = vst [vmem:[%s4170_s19 + $0x20] sm:$0xff] %v2365_v20 }
 0x501   : > { %v2319_v51 = vpop.permute.xlu0 %2318 }
 0x502   : > { %v2368_v45 = vsel %vm1026_vm7, %v4051_v4, %v2319_v51 }
 0x503   : > { %2387 = vst [vmem:[%s4170_s19 + $0x38] sm:$0xff] %v2368_v45 }
 0x506   : > { %v2315_v17 = vpop.permute.xlu0 %2314 }
 0x507   : > { %v2366_v35 = vsel %vm1026_vm7, %v4061_v44, %v2315_v17 }
 0x508   : > { %2385 = vst [vmem:[%s4170_s19 + $0x28] sm:$0xff] %v2366_v35 }
 0x50e   : > { %v2325_v31 = vpop.permute.xlu1 %2324 }
 0x50f   : > { %v2371_v53 = vsel %vm1026_vm7, %v4067_v12, %v2325_v31 }
 0x510   : > { %2390 = vst [vmem:[%s4170_s19 + $0x50] sm:$0xff] %v2371_v53 }
 0x516   : > { %v2321_v18 = vpop.permute.xlu1 %2320 }
 0x517   : > { %v2369_v1 = vsel %vm1026_vm7, %v4080_v54, %v2321_v18 }
 0x518   : > { %2388 = vst [vmem:[%s4170_s19 + $0x40] sm:$0xff] %v2369_v1 }
 0x519   : > { %v2327_v4 = vpop.permute.xlu0 %2326 }
 0x51a   : > { %v2372_v27 = vsel %vm1026_vm7, %v4091_v13, %v2327_v4 }
 0x51b   : > { %2391 = vst [vmem:[%s4170_s19 + $0x58] sm:$0xff] %v2372_v27 }
 0x51e   : > { %v2323_v44 = vpop.permute.xlu0 %2322 }
 0x51f   : > { %v2370_v15 = vsel %vm1026_vm7, %v4101_v50, %v2323_v44 }
 0x520   : > { %2389 = vst [vmem:[%s4170_s19 + $0x48] sm:$0xff] %v2370_v15 }
 0x526   : > { %v2333_v12 = vpop.permute.xlu1 %2332 }
 0x527   : > { %v2375_v22 = vsel %vm1026_vm7, %v4107_v39, %v2333_v12 }
 0x528   : > { %2394 = vst [vmem:[%s4170_s19 + $0x70] sm:$0xff] %v2375_v22 }
 0x52e   : > { %v2329_v54 = vpop.permute.xlu1 %2328 }
 0x52f   : > { %v2373_v25 = vsel %vm1026_vm7, %v4120_v36, %v2329_v54 }
 0x530   : > { %2392 = vst [vmem:[%s4170_s19 + $0x60] sm:$0xff] %v2373_v25 }
 0x531   : > { %v2335_v13 = vpop.permute.xlu0 %2334 }
 0x532   : > { %v2376_v48 = vsel %vm1026_vm7, %v4131_v14, %v2335_v13 }
 0x533   : > { %2395 = vst [vmem:[%s4170_s19 + $0x78] sm:$0xff] %v2376_v48 }
 0x536   : > { %v2331_v50 = vpop.permute.xlu0 %2330 }
 0x537   : > { %v2374_v16 = vsel %vm1026_vm7, %v4139_v5, %v2331_v50 }
 0x538   : > { %2393 = vst [vmem:[%s4170_s19 + $0x68] sm:$0xff] %v2374_v16 }
 0x53e   : > { %v2337_v11 = vpop.permute.xlu1 %2336 }
 0x53f   : > { %v2377_v39 = vsel %vm1026_vm7, %v2167_v42, %v2337_v11 }
 0x540   : > { %2396 = vst [vmem:[%s4170_s19 + $0x80] sm:$0xff] %v2377_v39 }
 0x541   : > { %v2339_v19 = vpop.permute.xlu0 %2338 }
 0x542   : > { %v2378_v34 = vsel %vm1026_vm7, %v2168_v56, %v2339_v19  ;;  %v2341_v36 = vpop.permute.xlu1 %2340 }
 0x543   : > { %2397 = vst [vmem:[%s4170_s19 + $0x88] sm:$0xff] %v2378_v34  ;;  %v2379_v8 = vsel %vm1026_vm7, %v2169_v37, %v2341_v36 }
 0x544   : > { %2398 = vst [vmem:[%s4170_s19 + $0x90] sm:$0xff] %v2379_v8 }
 0x545 PF: > { %s18_s27 = sadd.s32 1, %s2824_s27  }
 0x546   : > { %p15_p4 = scmp.ge.s32.totalorder %s18_s27, 4  }
 0x548   :  { %17 = sbr.rel (!%p15_p4) target bundleno = 1 (0x1), region = 85 }

</bundles_post_ra>
